<compile_context>
chip_gen: v5e
topology: v5e:2x2
jax: 0.10.0
libtpu: 0.0.40
codegen_flags: <defaults>
</compile_context>

<pallas_src>
import functools

import jax
import jax.numpy as jnp
from jax.experimental import pallas as pl
from jax.experimental.pallas import tpu as pltpu


# --------------------------------------------------------------------------- #
# Kernel
# --------------------------------------------------------------------------- #
def _conv_block_kernel(xs_ref, w1_ref, w2_ref, p1_ref, p1t_ref, p2_ref, p2t_ref,
                       b1_ref, g1_ref, be1_ref, b2_ref, g2_ref, be2_ref,
                       o_ref, *, H, L0, L1, count, residual, eps):
    """Fused ConvBlock in lane-packed layout, K taps folded into contraction.

    xs_ref  : (H, K*L0)   input slab; lane block dy holds padded row y+dy
    w1_ref  : (K*L0, L1)  stacked block-Toeplitz conv1 weights
    w2_ref  : (K*L1, L2)  stacked block-Toeplitz conv2 weights
    p*_ref  : (L, C) / (C, L) factored group-sum / broadcast matrices (0/1)
    b*/g*/be* : (1, L) packed conv bias / BN gamma / BN beta
    o_ref   : (H, L2)
    """
    inv_count = 1.0 / count

    # ---------------- conv1: single 3*L0-deep MXU matmul ----------------------
    acc1 = jnp.dot(xs_ref[...], w1_ref[...],
                   preferred_element_type=jnp.float32) + b1_ref[...]

    # ---------------- training-mode BatchNorm ---------------------------------
    def batchnorm(acc, p_ref, pt_ref, g_ref, be_ref):
        # Reduce over H first (XLU sublane reduce), then tiny group-sum matmul
        # and broadcast-back matmul.  var = E[x^2] - mean^2.
        sx = jnp.sum(acc, axis=0, keepdims=True)                    # (1, L)
        sxx = jnp.sum(acc * acc, axis=0, keepdims=True)             # (1, L)
        stats = jnp.concatenate([sx, sxx], axis=0) * inv_count      # (2, L)
        ch = jnp.dot(stats, p_ref[...],
                     preferred_element_type=jnp.float32)            # (2, C)
        lane = jnp.dot(ch, pt_ref[...],
                       preferred_element_type=jnp.float32)          # (2, L)
        mean = lane[0:1, :]
        var = lane[1:2, :] - mean * mean                            # biased var
        scale = g_ref[...] * jax.lax.rsqrt(var + eps)               # EUP slot
        shift = be_ref[...] - mean * scale
        return acc * scale + shift                                  # fused apply

    h = jnp.maximum(batchnorm(acc1, p1_ref, p1t_ref, g1_ref, be1_ref), 0.0)

    # ---------------- conv2: in-kernel (H, K*L1) slab, one matmul -------------
    # No (H+2, L1) padded intermediate: build the two shifted blocks directly.
    zrow = jnp.zeros((1, L1), jnp.float32)
    h_prev = jnp.concatenate([zrow, h[:H - 1, :]], axis=0)   # row y holds h[y-1]
    h_next = jnp.concatenate([h[1:, :], zrow], axis=0)       # row y holds h[y+1]
    slab2 = jnp.concatenate([h_prev, h, h_next], axis=1)     # (H, 3*L1)
    acc2 = jnp.dot(slab2, w2_ref[...],
                   preferred_element_type=jnp.float32) + b2_ref[...]

    # ---------------- bn2 + residual + ReLU ------------------------------------
    out = batchnorm(acc2, p2_ref, p2t_ref, g2_ref, be2_ref)
    if residual:
        # Re-read the centre lane block of the input slab at the point of use
        # (== the unpadded packed input rows); Cin==Cout so lane packings match.
        out = out + xs_ref[:, L0:2 * L0]
    o_ref[...] = jnp.maximum(out, 0.0).astype(o_ref.dtype)


# --------------------------------------------------------------------------- #
# Wrapper-side layout plumbing (weights / packing), done once per call.
# --------------------------------------------------------------------------- #
def _toeplitz_conv_weights(w_hwio, N, W, K, pad):
    """(K, K, Cin, Cout) taps -> (K, N*W*Cin, N*W*Cout) block-Toeplitz matrices.

    mats[dy][(n*W+xi)*Cin+ci, (n*W+xo)*Cout+co] = w[dy, xi-xo+pad, ci, co]
    with zeros where the horizontal tap falls outside the image (width padding
    folded in) or where the batch images differ (block-diagonal over n).
    """
    Cin, Cout = w_hwio.shape[2], w_hwio.shape[3]
    xi = jnp.arange(W)[:, None]
    xo = jnp.arange(W)[None, :]
    dx = xi - xo + pad                                  # (W, W)
    valid = ((dx >= 0) & (dx < K)).astype(w_hwio.dtype)
    dxc = jnp.clip(dx, 0, K - 1)
    eye_n = jnp.eye(N, dtype=w_hwio.dtype)
    mats = []
    for dy in range(K):
        blk = w_hwio[dy][dxc] * valid[:, :, None, None]            # (W, W, Cin, Cout)
        t = blk.transpose(0, 2, 1, 3).reshape(W * Cin, W * Cout)   # single image
        # TODO(synk): drop the kron (batch -> sublanes) once W*Cout >= 128.
        mats.append(jnp.kron(eye_n, t))                            # block-diag over n
    return jnp.stack(mats)                                         # (K, NWCin, NWCout)


def _channel_select_matrix(L, C, dtype=jnp.float32):
    """P[i, c] = 1 iff lane i holds channel c (i % C == c).  S = P @ P^T."""
    idx = jnp.arange(L)
    return (idx[:, None] % C == jnp.arange(C)[None, :]).astype(dtype)


def _pack_channel_vec(v, N, W):
    """(C,) per-channel vector -> (1, N*W*C) packed row (lane = (n*W+x)*C + c)."""
    return jnp.tile(v.astype(jnp.float32), N * W).reshape(1, -1)


def conv_block_forward(x_nchw, params, *, residual=True, K=3, pad=1, eps=1e-5):
    """x_nchw: [N, Cin, H, W] float32 (PyTorch layout). Returns [N, Cout, H, W]."""
    w1, b1, g1, be1, w2, b2, g2, be2 = params       # w*: (K, K, Cin, Cout) HWIO
    N, Cin, H, W = x_nchw.shape
    Chid, Cout = w1.shape[-1], w2.shape[-1]
    if residual:
        assert Cin == Cout, "residual connection requires Cin == Cout"

    L0, L1, L2 = N * W * Cin, N * W * Chid, N * W * Cout

    # NCHW -> lane-packed (H, N*W*Cin), height zero-pad, then the K-tap slab
    # (H, K*L0): lane block dy holds padded row y+dy (all wrapper-side glue).
    x_packed = jnp.transpose(x_nchw, (2, 0, 3, 1)).reshape(H, L0).astype(jnp.float32)
    xp = jnp.pad(x_packed, ((pad, pad), (0, 0)))
    x_slab = jnp.concatenate([xp[dy:dy + H, :] for dy in range(K)], axis=1)

    # Stacked Toeplitz weights: (K*L0, L1) / (K*L1, L2) -> one matmul per conv.
    w1s = _toeplitz_conv_weights(w1.astype(jnp.float32), N, W, K, pad).reshape(K * L0, L1)
    w2s = _toeplitz_conv_weights(w2.astype(jnp.float32), N, W, K, pad).reshape(K * L1, L2)

    # Factored group-sum matrices (S = P @ P^T), 0/1 entries.
    p1 = _channel_select_matrix(L1, Chid)
    p2 = _channel_select_matrix(L2, Cout)
    p1t, p2t = p1.T, p2.T

    b1p, g1p, be1p = (_pack_channel_vec(v, N, W) for v in (b1, g1, be1))
    b2p, g2p, be2p = (_pack_channel_vec(v, N, W) for v in (b2, g2, be2))

    kernel = functools.partial(
        _conv_block_kernel, H=H, L0=L0, L1=L1,
        count=float(N * H * W), residual=residual, eps=eps)

    def full_spec(shape):
        return pl.BlockSpec(shape, lambda i, _n=len(shape): (0,) * _n)

    operands = (x_slab, w1s, w2s, p1, p1t, p2, p2t,
                b1p, g1p, be1p, b2p, g2p, be2p)

    flops = 2 * H * K * (L0 * L1 + L1 * L2) + 8 * (L1 * Chid + L2 * Cout)
    bytes_acc = sum(int(a.size) * a.dtype.itemsize for a in operands) + H * L2 * 4

    out_packed = pl.pallas_call(
        kernel,
        out_shape=jax.ShapeDtypeStruct((H, L2), jnp.float32),
        grid=(1,),
        in_specs=[full_spec(a.shape) for a in operands],
        out_specs=full_spec((H, L2)),
        compiler_params=pltpu.CompilerParams(
            dimension_semantics=("arbitrary",),
            vmem_limit_bytes=8 * 1024 * 1024),
        cost_estimate=pl.CostEstimate(
            flops=int(flops), transcendentals=int(L1 + L2),
            bytes_accessed=int(bytes_acc)),
    )(*operands)

    # Unpack: (H, N*W*Cout) -> NCHW.
    out = out_packed.reshape(H, N, W, Cout).transpose(1, 3, 0, 2)
    return out.astype(x_nchw.dtype)


# --------------------------------------------------------------------------- #
# Pure-JAX reference (training-mode BN), parameter init, and the smoke test.
# --------------------------------------------------------------------------- #
def reference_forward(x_nchw, params, *, residual=True, K=3, pad=1, eps=1e-5):
    w1, b1, g1, be1, w2, b2, g2, be2 = params
    x = jnp.transpose(x_nchw, (0, 2, 3, 1))

    def conv(inp, w, b):
        y = jax.lax.conv_general_dilated(
            inp, w, window_strides=(1, 1),
            padding=[(pad, pad), (pad, pad)],
            dimension_numbers=("NHWC", "HWIO", "NHWC"))
        return y + b.reshape(1, 1, 1, -1)

    def bn(y, g, be):
        m = jnp.mean(y, axis=(0, 1, 2), keepdims=True)
        v = jnp.mean((y - m) ** 2, axis=(0, 1, 2), keepdims=True)
        return (y - m) * jax.lax.rsqrt(v + eps) * g.reshape(1, 1, 1, -1) \
            + be.reshape(1, 1, 1, -1)

    h = jnp.maximum(bn(conv(x, w1, b1), g1, be1), 0.0)
    o = bn(conv(h, w2, b2), g2, be2)
    if residual:
        o = o + x
    o = jnp.maximum(o, 0.0)
    return jnp.transpose(o, (0, 3, 1, 2))


def init_params(key, in_channels, hidden_channels, out_channels, K=3):
    """Deterministic synthetic params (shapes match nn.Conv2d / nn.BatchNorm2d)."""
    ks = jax.random.split(key, 8)
    w1_oihw = jax.random.normal(ks[0], (hidden_channels, in_channels, K, K), jnp.float32) * 0.2
    w2_oihw = jax.random.normal(ks[1], (out_channels, hidden_channels, K, K), jnp.float32) * 0.2
    to_hwio = lambda w: jnp.transpose(w, (2, 3, 1, 0))   # (K, K, Cin, Cout)
    w1, w2 = to_hwio(w1_oihw), to_hwio(w2_oihw)
    b1 = jax.random.normal(ks[2], (hidden_channels,), jnp.float32) * 0.1
    b2 = jax.random.normal(ks[3], (out_channels,), jnp.float32) * 0.1
    g1 = 1.0 + 0.5 * jax.random.normal(ks[4], (hidden_channels,), jnp.float32)
    be1 = 0.1 * jax.random.normal(ks[5], (hidden_channels,), jnp.float32)
    g2 = 1.0 + 0.5 * jax.random.normal(ks[6], (out_channels,), jnp.float32)
    be2 = 0.1 * jax.random.normal(ks[7], (out_channels,), jnp.float32)
    return (w1, b1, g1, be1, w2, b2, g2, be2)


if __name__ == "__main__":
    # ConvBlock(in_channels=4, out_channels=4, hidden_channels=8, residual=True,
    #           kernel_size=3, stride=[1, 1], padding=1)
    N, Cin, H, W = 2, 4, 16, 16
    Chid, Cout = 8, 4
    residual = True

    key = jax.random.PRNGKey(0)
    kx, kp = jax.random.split(key)
    x = jax.random.normal(kx, (N, Cin, H, W), jnp.float32)
    params = init_params(kp, Cin, Chid, Cout)

    out = jax.block_until_ready(conv_block_forward(x, params, residual=residual))
    ref = jax.block_until_ready(reference_forward(x, params, residual=residual))

    assert out.shape == (N, Cout, H, W)
    assert jnp.allclose(out, ref, rtol=2e-4, atol=2e-4), \
        f"max abs diff {jnp.max(jnp.abs(out - ref))}"

    print("KERNEL_OK")
</pallas_src>

<mosaic_0001>
module attributes {stable_mosaic.version = 11 : i64} {
  func.func @_conv_block_kernel(%arg0: i32, %arg1: memref<16x384xf32, #tpu.memory_space<vmem>>, %arg2: memref<384x256xf32, #tpu.memory_space<vmem>>, %arg3: memref<768x128xf32, #tpu.memory_space<vmem>>, %arg4: memref<256x8xf32, #tpu.memory_space<vmem>>, %arg5: memref<8x256xf32, #tpu.memory_space<vmem>>, %arg6: memref<128x4xf32, #tpu.memory_space<vmem>>, %arg7: memref<4x128xf32, #tpu.memory_space<vmem>>, %arg8: memref<1x256xf32, #tpu.memory_space<vmem>>, %arg9: memref<1x256xf32, #tpu.memory_space<vmem>>, %arg10: memref<1x256xf32, #tpu.memory_space<vmem>>, %arg11: memref<1x128xf32, #tpu.memory_space<vmem>>, %arg12: memref<1x128xf32, #tpu.memory_space<vmem>>, %arg13: memref<1x128xf32, #tpu.memory_space<vmem>>, %arg14: memref<16x128xf32, #tpu.memory_space<vmem>>) attributes {dimension_semantics = [#tpu.dimension_semantics<arbitrary>], iteration_bounds = array<i64: 1>, scalar_prefetch = 0 : i64, scratch_operands = 0 : i64, tpu.core_type = #tpu.core_type<tc>, window_params = [{pipeline_mode = #tpu.pipeline_mode<synchronous>, transform_indices = @transform_0, window_bounds = array<i64: 16, 384>}, {pipeline_mode = #tpu.pipeline_mode<synchronous>, transform_indices = @transform_1, window_bounds = array<i64: 384, 256>}, {pipeline_mode = #tpu.pipeline_mode<synchronous>, transform_indices = @transform_2, window_bounds = array<i64: 768, 128>}, {pipeline_mode = #tpu.pipeline_mode<synchronous>, transform_indices = @transform_3, window_bounds = array<i64: 256, 8>}, {pipeline_mode = #tpu.pipeline_mode<synchronous>, transform_indices = @transform_4, window_bounds = array<i64: 8, 256>}, {pipeline_mode = #tpu.pipeline_mode<synchronous>, transform_indices = @transform_5, window_bounds = array<i64: 128, 4>}, {pipeline_mode = #tpu.pipeline_mode<synchronous>, transform_indices = @transform_6, window_bounds = array<i64: 4, 128>}, {pipeline_mode = #tpu.pipeline_mode<synchronous>, transform_indices = @transform_7, window_bounds = array<i64: 1, 256>}, {pipeline_mode = #tpu.pipeline_mode<synchronous>, transform_indices = @transform_8, window_bounds = array<i64: 1, 256>}, {pipeline_mode = #tpu.pipeline_mode<synchronous>, transform_indices = @transform_9, window_bounds = array<i64: 1, 256>}, {pipeline_mode = #tpu.pipeline_mode<synchronous>, transform_indices = @transform_10, window_bounds = array<i64: 1, 128>}, {pipeline_mode = #tpu.pipeline_mode<synchronous>, transform_indices = @transform_11, window_bounds = array<i64: 1, 128>}, {pipeline_mode = #tpu.pipeline_mode<synchronous>, transform_indices = @transform_12, window_bounds = array<i64: 1, 128>}, {pipeline_mode = #tpu.pipeline_mode<synchronous>, transform_indices = @transform_13, window_bounds = array<i64: 16, 128>}]} {
    %c0 = arith.constant 0 : index
    %c0_0 = arith.constant 0 : index
    %0 = vector.load %arg1[%c0, %c0_0] : memref<16x384xf32, #tpu.memory_space<vmem>>, vector<16x384xf32>
    %c0_1 = arith.constant 0 : index
    %c0_2 = arith.constant 0 : index
    %1 = vector.load %arg2[%c0_1, %c0_2] : memref<384x256xf32, #tpu.memory_space<vmem>>, vector<384x256xf32>
    %cst = arith.constant dense<0.000000e+00> : vector<16x256xf32>
    %2 = tpu.matmul %0, %1, %cst {dimension_numbers = #tpu.dot_dimension_numbers<[1], [0], [0], [1], [0, 0, 1, 1], [], []>} : vector<16x384xf32>, vector<384x256xf32>, vector<16x256xf32> -> vector<16x256xf32>
    %c0_3 = arith.constant 0 : index
    %c0_4 = arith.constant 0 : index
    %3 = vector.load %arg8[%c0_3, %c0_4] : memref<1x256xf32, #tpu.memory_space<vmem>>, vector<1x256xf32>
    %4 = vector.broadcast %3 : vector<1x256xf32> to vector<16x256xf32>
    %5 = arith.addf %2, %4 : vector<16x256xf32>
    %cst_5 = arith.constant dense<0.000000e+00> : vector<256xf32>
    %6 = vector.multi_reduction <add>, %5, %cst_5 [0] : vector<16x256xf32> to vector<256xf32>
    %7 = vector.shape_cast %6 : vector<256xf32> to vector<1x256xf32>
    %8 = arith.mulf %5, %5 : vector<16x256xf32>
    %cst_6 = arith.constant dense<0.000000e+00> : vector<256xf32>
    %9 = vector.multi_reduction <add>, %8, %cst_6 [0] : vector<16x256xf32> to vector<256xf32>
    %10 = vector.shape_cast %9 : vector<256xf32> to vector<1x256xf32>
    %11 = tpu.concatenate %7, %10 in 0 : vector<1x256xf32>, vector<1x256xf32> -> vector<2x256xf32>
    %cst_7 = arith.constant 0.001953125 : f32
    %12 = vector.broadcast %cst_7 : f32 to vector<2x256xf32>
    %13 = arith.mulf %11, %12 : vector<2x256xf32>
    %c0_8 = arith.constant 0 : index
    %c0_9 = arith.constant 0 : index
    %14 = vector.load %arg4[%c0_8, %c0_9] : memref<256x8xf32, #tpu.memory_space<vmem>>, vector<256x8xf32>
    %cst_10 = arith.constant dense<0.000000e+00> : vector<2x8xf32>
    %15 = tpu.matmul %13, %14, %cst_10 {dimension_numbers = #tpu.dot_dimension_numbers<[1], [0], [0], [1], [0, 0, 1, 1], [], []>} : vector<2x256xf32>, vector<256x8xf32>, vector<2x8xf32> -> vector<2x8xf32>
    %c0_11 = arith.constant 0 : index
    %c0_12 = arith.constant 0 : index
    %16 = vector.load %arg5[%c0_11, %c0_12] : memref<8x256xf32, #tpu.memory_space<vmem>>, vector<8x256xf32>
    %cst_13 = arith.constant dense<0.000000e+00> : vector<2x256xf32>
    %17 = tpu.matmul %15, %16, %cst_13 {dimension_numbers = #tpu.dot_dimension_numbers<[1], [0], [0], [1], [0, 0, 1, 1], [], []>} : vector<2x8xf32>, vector<8x256xf32>, vector<2x256xf32> -> vector<2x256xf32>
    %18 = vector.extract_strided_slice %17 {offsets = [0, 0], sizes = [1, 256], strides = [1, 1]} : vector<2x256xf32> to vector<1x256xf32>
    %19 = vector.extract_strided_slice %17 {offsets = [1, 0], sizes = [1, 256], strides = [1, 1]} : vector<2x256xf32> to vector<1x256xf32>
    %20 = arith.mulf %18, %18 : vector<1x256xf32>
    %21 = arith.subf %19, %20 : vector<1x256xf32>
    %c0_14 = arith.constant 0 : index
    %c0_15 = arith.constant 0 : index
    %22 = vector.load %arg9[%c0_14, %c0_15] : memref<1x256xf32, #tpu.memory_space<vmem>>, vector<1x256xf32>
    %cst_16 = arith.constant 9.99999974E-6 : f32
    %23 = vector.broadcast %cst_16 : f32 to vector<1x256xf32>
    %24 = arith.addf %21, %23 : vector<1x256xf32>
    %25 = math.rsqrt %24 : vector<1x256xf32>
    %26 = arith.mulf %22, %25 : vector<1x256xf32>
    %c0_17 = arith.constant 0 : index
    %c0_18 = arith.constant 0 : index
    %27 = vector.load %arg10[%c0_17, %c0_18] : memref<1x256xf32, #tpu.memory_space<vmem>>, vector<1x256xf32>
    %28 = arith.mulf %18, %26 : vector<1x256xf32>
    %29 = arith.subf %27, %28 : vector<1x256xf32>
    %30 = vector.broadcast %26 : vector<1x256xf32> to vector<16x256xf32>
    %31 = arith.mulf %5, %30 : vector<16x256xf32>
    %32 = vector.broadcast %29 : vector<1x256xf32> to vector<16x256xf32>
    %33 = arith.addf %31, %32 : vector<16x256xf32>
    %cst_19 = arith.constant 0.000000e+00 : f32
    %34 = vector.broadcast %cst_19 : f32 to vector<16x256xf32>
    %35 = arith.maximumf %33, %34 : vector<16x256xf32>
    %cst_20 = arith.constant 0.000000e+00 : f32
    %36 = vector.broadcast %cst_20 : f32 to vector<1x256xf32>
    %37 = vector.extract_strided_slice %35 {offsets = [0, 0], sizes = [15, 256], strides = [1, 1]} : vector<16x256xf32> to vector<15x256xf32>
    %38 = tpu.concatenate %36, %37 in 0 : vector<1x256xf32>, vector<15x256xf32> -> vector<16x256xf32>
    %39 = vector.extract_strided_slice %35 {offsets = [1, 0], sizes = [15, 256], strides = [1, 1]} : vector<16x256xf32> to vector<15x256xf32>
    %40 = tpu.concatenate %39, %36 in 0 : vector<15x256xf32>, vector<1x256xf32> -> vector<16x256xf32>
    %41 = tpu.concatenate %38, %35, %40 in 1 : vector<16x256xf32>, vector<16x256xf32>, vector<16x256xf32> -> vector<16x768xf32>
    %c0_21 = arith.constant 0 : index
    %c0_22 = arith.constant 0 : index
    %42 = vector.load %arg3[%c0_21, %c0_22] : memref<768x128xf32, #tpu.memory_space<vmem>>, vector<768x128xf32>
    %cst_23 = arith.constant dense<0.000000e+00> : vector<16x128xf32>
    %43 = tpu.matmul %41, %42, %cst_23 {dimension_numbers = #tpu.dot_dimension_numbers<[1], [0], [0], [1], [0, 0, 1, 1], [], []>} : vector<16x768xf32>, vector<768x128xf32>, vector<16x128xf32> -> vector<16x128xf32>
    %c0_24 = arith.constant 0 : index
    %c0_25 = arith.constant 0 : index
    %44 = vector.load %arg11[%c0_24, %c0_25] : memref<1x128xf32, #tpu.memory_space<vmem>>, vector<1x128xf32>
    %45 = vector.broadcast %44 : vector<1x128xf32> to vector<16x128xf32>
    %46 = arith.addf %43, %45 : vector<16x128xf32>
    %cst_26 = arith.constant dense<0.000000e+00> : vector<128xf32>
    %47 = vector.multi_reduction <add>, %46, %cst_26 [0] : vector<16x128xf32> to vector<128xf32>
    %48 = vector.shape_cast %47 : vector<128xf32> to vector<1x128xf32>
    %49 = arith.mulf %46, %46 : vector<16x128xf32>
    %cst_27 = arith.constant dense<0.000000e+00> : vector<128xf32>
    %50 = vector.multi_reduction <add>, %49, %cst_27 [0] : vector<16x128xf32> to vector<128xf32>
    %51 = vector.shape_cast %50 : vector<128xf32> to vector<1x128xf32>
    %52 = tpu.concatenate %48, %51 in 0 : vector<1x128xf32>, vector<1x128xf32> -> vector<2x128xf32>
    %cst_28 = arith.constant 0.001953125 : f32
    %53 = vector.broadcast %cst_28 : f32 to vector<2x128xf32>
    %54 = arith.mulf %52, %53 : vector<2x128xf32>
    %c0_29 = arith.constant 0 : index
    %c0_30 = arith.constant 0 : index
    %55 = vector.load %arg6[%c0_29, %c0_30] : memref<128x4xf32, #tpu.memory_space<vmem>>, vector<128x4xf32>
    %cst_31 = arith.constant dense<0.000000e+00> : vector<2x4xf32>
    %56 = tpu.matmul %54, %55, %cst_31 {dimension_numbers = #tpu.dot_dimension_numbers<[1], [0], [0], [1], [0, 0, 1, 1], [], []>} : vector<2x128xf32>, vector<128x4xf32>, vector<2x4xf32> -> vector<2x4xf32>
    %c0_32 = arith.constant 0 : index
    %c0_33 = arith.constant 0 : index
    %57 = vector.load %arg7[%c0_32, %c0_33] : memref<4x128xf32, #tpu.memory_space<vmem>>, vector<4x128xf32>
    %cst_34 = arith.constant dense<0.000000e+00> : vector<2x128xf32>
    %58 = tpu.matmul %56, %57, %cst_34 {dimension_numbers = #tpu.dot_dimension_numbers<[1], [0], [0], [1], [0, 0, 1, 1], [], []>} : vector<2x4xf32>, vector<4x128xf32>, vector<2x128xf32> -> vector<2x128xf32>
    %59 = vector.extract_strided_slice %58 {offsets = [0, 0], sizes = [1, 128], strides = [1, 1]} : vector<2x128xf32> to vector<1x128xf32>
    %60 = vector.extract_strided_slice %58 {offsets = [1, 0], sizes = [1, 128], strides = [1, 1]} : vector<2x128xf32> to vector<1x128xf32>
    %61 = arith.mulf %59, %59 : vector<1x128xf32>
    %62 = arith.subf %60, %61 : vector<1x128xf32>
    %c0_35 = arith.constant 0 : index
    %c0_36 = arith.constant 0 : index
    %63 = vector.load %arg12[%c0_35, %c0_36] : memref<1x128xf32, #tpu.memory_space<vmem>>, vector<1x128xf32>
    %cst_37 = arith.constant 9.99999974E-6 : f32
    %64 = vector.broadcast %cst_37 : f32 to vector<1x128xf32>
    %65 = arith.addf %62, %64 : vector<1x128xf32>
    %66 = math.rsqrt %65 : vector<1x128xf32>
    %67 = arith.mulf %63, %66 : vector<1x128xf32>
    %c0_38 = arith.constant 0 : index
    %c0_39 = arith.constant 0 : index
    %68 = vector.load %arg13[%c0_38, %c0_39] : memref<1x128xf32, #tpu.memory_space<vmem>>, vector<1x128xf32>
    %69 = arith.mulf %59, %67 : vector<1x128xf32>
    %70 = arith.subf %68, %69 : vector<1x128xf32>
    %71 = vector.broadcast %67 : vector<1x128xf32> to vector<16x128xf32>
    %72 = arith.mulf %46, %71 : vector<16x128xf32>
    %73 = vector.broadcast %70 : vector<1x128xf32> to vector<16x128xf32>
    %74 = arith.addf %72, %73 : vector<16x128xf32>
    %c0_40 = arith.constant 0 : index
    %c128 = arith.constant 128 : index
    %75 = vector.load %arg1[%c0_40, %c128] : memref<16x384xf32, #tpu.memory_space<vmem>>, vector<16x128xf32>
    %76 = arith.addf %74, %75 : vector<16x128xf32>
    %cst_41 = arith.constant 0.000000e+00 : f32
    %77 = vector.broadcast %cst_41 : f32 to vector<16x128xf32>
    %78 = arith.maximumf %76, %77 : vector<16x128xf32>
    %c0_42 = arith.constant 0 : index
    %c0_43 = arith.constant 0 : index
    %79 = vector.load %arg14[%c0_42, %c0_43] : memref<16x128xf32, #tpu.memory_space<vmem>>, vector<16x128xf32>
    tpu.vector_store %arg14[%c0_42, %c0_43], %78 {strides = array<i32>} : memref<16x128xf32, #tpu.memory_space<vmem>>, vector<16x128xf32>,
    return
  }
  func.func @transform_0(%arg0: i32) -> (i32, i32) {
    %c0_i32 = arith.constant 0 : i32
    %c0_i32_0 = arith.constant 0 : i32
    %c0_i32_1 = arith.constant 0 : i32
    return %c0_i32, %c0_i32_0 : i32, i32
  }
  func.func @transform_1(%arg0: i32) -> (i32, i32) {
    %c0_i32 = arith.constant 0 : i32
    %c0_i32_0 = arith.constant 0 : i32
    %c0_i32_1 = arith.constant 0 : i32
    return %c0_i32, %c0_i32_0 : i32, i32
  }
  func.func @transform_2(%arg0: i32) -> (i32, i32) {
    %c0_i32 = arith.constant 0 : i32
    %c0_i32_0 = arith.constant 0 : i32
    %c0_i32_1 = arith.constant 0 : i32
    return %c0_i32, %c0_i32_0 : i32, i32
  }
  func.func @transform_3(%arg0: i32) -> (i32, i32) {
    %c0_i32 = arith.constant 0 : i32
    %c0_i32_0 = arith.constant 0 : i32
    %c0_i32_1 = arith.constant 0 : i32
    return %c0_i32, %c0_i32_0 : i32, i32
  }
  func.func @transform_4(%arg0: i32) -> (i32, i32) {
    %c0_i32 = arith.constant 0 : i32
    %c0_i32_0 = arith.constant 0 : i32
    %c0_i32_1 = arith.constant 0 : i32
    return %c0_i32, %c0_i32_0 : i32, i32
  }
  func.func @transform_5(%arg0: i32) -> (i32, i32) {
    %c0_i32 = arith.constant 0 : i32
    %c0_i32_0 = arith.constant 0 : i32
    %c0_i32_1 = arith.constant 0 : i32
    return %c0_i32, %c0_i32_0 : i32, i32
  }
  func.func @transform_6(%arg0: i32) -> (i32, i32) {
    %c0_i32 = arith.constant 0 : i32
    %c0_i32_0 = arith.constant 0 : i32
    %c0_i32_1 = arith.constant 0 : i32
    return %c0_i32, %c0_i32_0 : i32, i32
  }
  func.func @transform_7(%arg0: i32) -> (i32, i32) {
    %c0_i32 = arith.constant 0 : i32
    %c0_i32_0 = arith.constant 0 : i32
    %c0_i32_1 = arith.constant 0 : i32
    return %c0_i32, %c0_i32_0 : i32, i32
  }
  func.func @transform_8(%arg0: i32) -> (i32, i32) {
    %c0_i32 = arith.constant 0 : i32
    %c0_i32_0 = arith.constant 0 : i32
    %c0_i32_1 = arith.constant 0 : i32
    return %c0_i32, %c0_i32_0 : i32, i32
  }
  func.func @transform_9(%arg0: i32) -> (i32, i32) {
    %c0_i32 = arith.constant 0 : i32
    %c0_i32_0 = arith.constant 0 : i32
    %c0_i32_1 = arith.constant 0 : i32
    return %c0_i32, %c0_i32_0 : i32, i32
  }
  func.func @transform_10(%arg0: i32) -> (i32, i32) {
    %c0_i32 = arith.constant 0 : i32
    %c0_i32_0 = arith.constant 0 : i32
    %c0_i32_1 = arith.constant 0 : i32
    return %c0_i32, %c0_i32_0 : i32, i32
  }
  func.func @transform_11(%arg0: i32) -> (i32, i32) {
    %c0_i32 = arith.constant 0 : i32
    %c0_i32_0 = arith.constant 0 : i32
    %c0_i32_1 = arith.constant 0 : i32
    return %c0_i32, %c0_i32_0 : i32, i32
  }
  func.func @transform_12(%arg0: i32) -> (i32, i32) {
    %c0_i32 = arith.constant 0 : i32
    %c0_i32_0 = arith.constant 0 : i32
    %c0_i32_1 = arith.constant 0 : i32
    return %c0_i32, %c0_i32_0 : i32, i32
  }
  func.func @transform_13(%arg0: i32) -> (i32, i32) {
    %c0_i32 = arith.constant 0 : i32
    %c0_i32_0 = arith.constant 0 : i32
    %c0_i32_1 = arith.constant 0 : i32
    return %c0_i32, %c0_i32_0 : i32, i32
  }
}

</mosaic_0001>

<bundles_post_ra>
// kernel: tpu_custom_call.1
= control target key start
LH: loop header
LB: loop body
LE: loop exit
PB: predicated region body
PF: predicated region fallthrough
CT: control target
= control target key end

     0   :  { %18 = vsyncpa [#allocation3], 0  ;;  %s1423_s0 = inlined_call_operand.vmem [shape: f32[16,384], index: 0, kind: input, shape index: {}]   ;;  %s1424_s1 = inlined_call_operand.hbm [shape: f32[384,256], index: 1, kind: input, shape index: {}]   ;;  %s1425_s2 = inlined_call_operand.hbm [shape: f32[768,128], index: 2, kind: input, shape index: {}]   ;;  %s1426_s3 = inlined_call_operand.vmem [shape: f32[256,8], index: 3, kind: input, shape index: {}]   ;;  %s1427_s4 = inlined_call_operand.vmem [shape: f32[8,256], index: 4, kind: input, shape index: {}]   ;;  %s1428_s5 = inlined_call_operand.vmem [shape: f32[128,4], index: 5, kind: input, shape index: {}]   ;;  %s1429_s6 = inlined_call_operand.vmem [shape: f32[4,128], index: 6, kind: input, shape index: {}]   ;;  %s1430_s7 = inlined_call_operand.vmem [shape: f32[1,256], index: 7, kind: input, shape index: {}]   ;;  %s1431_s8 = inlined_call_operand.vmem [shape: f32[1,256], index: 8, kind: input, shape index: {}]   ;;  %s1432_s9 = inlined_call_operand.vmem [shape: f32[1,256], index: 9, kind: input, shape index: {}]   ;;  %s1433_s10 = inlined_call_operand.vmem [shape: f32[1,128], index: 10, kind: input, shape index: {}]   ;;  %s1434_s11 = inlined_call_operand.vmem [shape: f32[1,128], index: 11, kind: input, shape index: {}]   ;;  %s1435_s12 = inlined_call_operand.vmem [shape: f32[1,128], index: 12, kind: input, shape index: {}]   ;;  %s1436_s13 = inlined_call_operand.hbm [shape: f32[16,128], index: 13, kind: output, shape index: {}]  }
   0x1   :  { %19 = vsyncpa [#allocation6], 0 }
   0x2   :  { %20 = vsyncpa [#allocation4], 0  ;;  %s27_s27 = sshll.u32 %s1424_s1, 4  ;;  %s1066_s28 = smov [#allocation2]   ;;  %s28_s27 = int_to_ptr.hbm [resolvable:$true] %s27_s27 }
   0x3   :  { %s29_s29 = sshll.u32 %s1066_s28, 4  ;;  %s40_s15 = sshll.u32 %s1425_s2, 4  ;;  %s30_s29 = int_to_ptr.vmem [resolvable:$true] %s29_s29  ;;  %s41_s15 = int_to_ptr.hbm [resolvable:$true] %s40_s15 }
   0x4   :  { %s1067_s16 = smov 256   ;;  %s1068_s17 = smov 16  }
   0x5   :  { %35 = dma.hbm_to_vmem [thread:$0]  %s28_s27, 12288, %s30_s29, [#allocation3], %s1067_s16, %s1067_s16, %s1068_s17  }
   0x6   :  { %s1069_s18 = smov [#allocation5]   ;;  %s1070_s20 = smov 128  }
   0x7   :  { %s42_s19 = sshll.u32 %s1069_s18, 4  ;;  %s1071_s21 = smov 8   ;;  %s43_s19 = int_to_ptr.vmem [resolvable:$true] %s42_s19 }
   0x8   :  { %48 = dma.hbm_to_vmem [thread:$0]  %s41_s15, 12288, %s43_s19, [#allocation6], %s1070_s20, %s1070_s20, %s1071_s21  }
   0x9   :  { %1060 = dma.done.wait [#allocation3], 12288  }
   0xa   :  { %1061 = vsyncadd [#allocation3], 4294955008 }
   0xb   :  { %1062 = dma.done.wait [#allocation6], 12288  }
   0xc   :  { %1063 = vsyncadd [#allocation6], 4294955008  ;;  %v113_v0 = vld [vmem:[#allocation2 + $0xf0] sm:$0xff]  ;;  %v111_v2 = vld [vmem:[#allocation2 + $0xe0] sm:$0xff]  ;;  %vm355_vm0 = vcmask 1040384   ;;  %vm434_vm1 = vcmask 64512  }
   0xd   :  { %v177_v1 = vld [vmem:[#allocation2 + $0x2f0] sm:$0xff]  ;;  %185 = vmatpush.msra.mxu0 %v113_v0  ;;  %v175_v4 = vld [vmem:[#allocation2 + $0x2e0] sm:$0xff]  ;;  %v114_v21 = vld [vmem:[#allocation2 + $0xf8] sm:$0xff]  ;;  %vm566_vm9 = vcmask 1046528   ;;  %vm876_vm10 = vcmask 1043456   ;;  %vm872_vm11 = vcmask 31744  }
   0xe   :  { %231 = vmatpush.msra.mxu2 %v177_v1  ;;  %v145_v3 = vld [vmem:[#allocation2 + $0x1f0] sm:$0xff]  ;;  %v143_v6 = vld [vmem:[#allocation2 + $0x1e0] sm:$0xff]  ;;  %254 = vmatpush.msra.mxu3 %v114_v21  ;;  %v112_v25 = vld [vmem:[#allocation2 + $0xe8] sm:$0xff] }
   0xf   :  { %208 = vmatpush.msra.mxu1 %v145_v3  ;;  %v109_v5 = vld [vmem:[#allocation2 + $0xd0] sm:$0xff]  ;;  %186 = vmatpush.msra.mxu0 %v111_v2  ;;  %v107_v9 = vld [vmem:[#allocation2 + $0xc0] sm:$0xff]  ;;  %v110_v28 = vld [vmem:[#allocation2 + $0xd8] sm:$0xff] }
  0x10   :  { %v173_v7 = vld [vmem:[#allocation2 + $0x2d0] sm:$0xff]  ;;  %232 = vmatpush.msra.mxu2 %v175_v4  ;;  %v171_v10 = vld [vmem:[#allocation2 + $0x2c0] sm:$0xff]  ;;  %255 = vmatpush.msra.mxu3 %v112_v25  ;;  %v108_v30 = vld [vmem:[#allocation2 + $0xc8] sm:$0xff] }
  0x11   :  { %v141_v8 = vld [vmem:[#allocation2 + $0x1d0] sm:$0xff]  ;;  %209 = vmatpush.msra.mxu1 %v143_v6  ;;  %187 = vmatpush.msra.mxu0 %v109_v5  ;;  %v139_v11 = vld [vmem:[#allocation2 + $0x1c0] sm:$0xff]  ;;  %v106_v34 = vld [vmem:[#allocation2 + $0xb8] sm:$0xff] }
  0x12   :  { %233 = vmatpush.msra.mxu2 %v173_v7  ;;  %v105_v12 = vld [vmem:[#allocation2 + $0xb0] sm:$0xff]  ;;  %v103_v15 = vld [vmem:[#allocation2 + $0xa0] sm:$0xff]  ;;  %256 = vmatpush.msra.mxu3 %v110_v28  ;;  %v104_v38 = vld [vmem:[#allocation2 + $0xa8] sm:$0xff] }
  0x13   :  { %210 = vmatpush.msra.mxu1 %v141_v8  ;;  %v169_v13 = vld [vmem:[#allocation2 + $0x2b0] sm:$0xff]  ;;  %188 = vmatpush.msra.mxu0 %v107_v9  ;;  %v167_v16 = vld [vmem:[#allocation2 + $0x2a0] sm:$0xff]  ;;  %v102_v42 = vld [vmem:[#allocation2 + $0x98] sm:$0xff] }
  0x14   :  { %234 = vmatpush.msra.mxu2 %v171_v10  ;;  %v137_v14 = vld [vmem:[#allocation2 + $0x1b0] sm:$0xff]  ;;  %v135_v17 = vld [vmem:[#allocation2 + $0x1a0] sm:$0xff]  ;;  %257 = vmatpush.msra.mxu3 %v108_v30  ;;  %v100_v46 = vld [vmem:[#allocation2 + $0x88] sm:$0xff] }
  0x15   :  { %211 = vmatpush.msra.mxu1 %v139_v11  ;;  %189 = vmatpush.msra.mxu0 %v105_v12  ;;  %v101_v18 = vld [vmem:[#allocation2 + $0x90] sm:$0xff]  ;;  %v99_v22 = vld [vmem:[#allocation2 + $0x80] sm:$0xff]  ;;  %v98_v50 = vld [vmem:[#allocation2 + $0x78] sm:$0xff] }
  0x16   :  { %235 = vmatpush.msra.mxu2 %v169_v13  ;;  %v165_v19 = vld [vmem:[#allocation2 + $0x290] sm:$0xff]  ;;  %v163_v23 = vld [vmem:[#allocation2 + $0x280] sm:$0xff]  ;;  %258 = vmatpush.msra.mxu3 %v106_v34  ;;  %v96_v54 = vld [vmem:[#allocation2 + $0x68] sm:$0xff] }
  0x17   :  { %212 = vmatpush.msra.mxu1 %v137_v14  ;;  %190 = vmatpush.msra.mxu0 %v103_v15  ;;  %v133_v20 = vld [vmem:[#allocation2 + $0x190] sm:$0xff]  ;;  %v131_v24 = vld [vmem:[#allocation2 + $0x180] sm:$0xff]  ;;  %v1155_v57 = vld [vmem:[%s1423_s0 + $0x10] sm:$0xff] }
  0x18   :  { %236 = vmatpush.msra.mxu2 %v167_v16  ;;  %v97_v26 = vld [vmem:[#allocation2 + $0x70] sm:$0xff]  ;;  %v95_v31 = vld [vmem:[#allocation2 + $0x60] sm:$0xff]  ;;  %259 = vmatpush.msra.mxu3 %v104_v38  ;;  %v146_v58 = vld [vmem:[#allocation2 + $0x1f8] sm:$0xff] }
  0x19   :  { %213 = vmatpush.msra.mxu1 %v135_v17  ;;  %191 = vmatpush.msra.mxu0 %v101_v18  ;;  %v161_v27 = vld [vmem:[#allocation2 + $0x270] sm:$0xff]  ;;  %v159_v32 = vld [vmem:[#allocation2 + $0x260] sm:$0xff]  ;;  %v77_v60 = vld [vmem:[%s1423_s0] sm:$0xff] }
  0x1a   :  { %237 = vmatpush.msra.mxu2 %v165_v19  ;;  %v129_v29 = vld [vmem:[#allocation2 + $0x170] sm:$0xff]  ;;  %v127_v33 = vld [vmem:[#allocation2 + $0x160] sm:$0xff]  ;;  %260 = vmatpush.msra.mxu3 %v102_v42  ;;  %v144_v61 = vld [vmem:[#allocation2 + $0x1e8] sm:$0xff] }
  0x1b   :  { %214 = vmatpush.msra.mxu1 %v133_v20  ;;  %192 = vmatpush.msra.mxu0 %v99_v22  ;;  %v93_v35 = vld [vmem:[#allocation2 + $0x50] sm:$0xff]  ;;  %v91_v39 = vld [vmem:[#allocation2 + $0x40] sm:$0xff]  ;;  %v178_v62 = vld [vmem:[#allocation2 + $0x2f8] sm:$0xff] }
  0x1c   :  { %238 = vmatpush.msra.mxu2 %v163_v23  ;;  %v157_v36 = vld [vmem:[#allocation2 + $0x250] sm:$0xff]  ;;  %v155_v40 = vld [vmem:[#allocation2 + $0x240] sm:$0xff]  ;;  %261 = vmatpush.msra.mxu3 %v100_v46  ;;  %v94_v0 = vld [vmem:[#allocation2 + $0x58] sm:$0xff] }
  0x1d   :  { %215 = vmatpush.msra.mxu1 %v131_v24  ;;  %193 = vmatpush.msra.mxu0 %v97_v26  ;;  %v125_v37 = vld [vmem:[#allocation2 + $0x150] sm:$0xff]  ;;  %v123_v41 = vld [vmem:[#allocation2 + $0x140] sm:$0xff]  ;;  %v142_v1 = vld [vmem:[#allocation2 + $0x1d8] sm:$0xff] }
  0x1e   :  { %239 = vmatpush.msra.mxu2 %v161_v27  ;;  %v89_v43 = vld [vmem:[#allocation2 + $0x30] sm:$0xff]  ;;  %v87_v47 = vld [vmem:[#allocation2 + $0x20] sm:$0xff]  ;;  %262 = vmatpush.msra.mxu3 %v98_v50  ;;  %v176_v2 = vld [vmem:[#allocation2 + $0x2e8] sm:$0xff] }
  0x1f   :  { %216 = vmatpush.msra.mxu1 %v129_v29  ;;  %194 = vmatpush.msra.mxu0 %v95_v31  ;;  %v153_v44 = vld [vmem:[#allocation2 + $0x230] sm:$0xff]  ;;  %v151_v48 = vld [vmem:[#allocation2 + $0x220] sm:$0xff]  ;;  %v92_v3 = vld [vmem:[#allocation2 + $0x48] sm:$0xff] }
  0x20   :  { %240 = vmatpush.msra.mxu2 %v159_v32  ;;  %v121_v45 = vld [vmem:[#allocation2 + $0x130] sm:$0xff]  ;;  %v119_v49 = vld [vmem:[#allocation2 + $0x120] sm:$0xff]  ;;  %263 = vmatpush.msra.mxu3 %v96_v54  ;;  %v140_v4 = vld [vmem:[#allocation2 + $0x1c8] sm:$0xff] }
  0x21   :  { %217 = vmatpush.msra.mxu1 %v127_v33  ;;  %195 = vmatpush.msra.mxu0 %v93_v35  ;;  %v85_v51 = vld [vmem:[#allocation2 + $0x10] sm:$0xff]  ;;  %v83_v55 = vld [vmem:[#allocation2] sm:$0xff]  ;;  %v174_v5 = vld [vmem:[#allocation2 + $0x2d8] sm:$0xff] }
  0x22   :  { %241 = vmatpush.msra.mxu2 %v157_v36  ;;  %v149_v52 = vld [vmem:[#allocation2 + $0x210] sm:$0xff]  ;;  %v147_v56 = vld [vmem:[#allocation2 + $0x200] sm:$0xff]  ;;  %264 = vmatpush.msra.mxu3 %v94_v0  ;;  %v90_v6 = vld [vmem:[#allocation2 + $0x38] sm:$0xff] }
  0x23   :  { %218 = vmatpush.msra.mxu1 %v125_v37  ;;  %196 = vmatpush.msra.mxu0 %v91_v39  ;;  %v117_v53 = vld [vmem:[#allocation2 + $0x110] sm:$0xff]  ;;  %v115_v59 = vld [vmem:[#allocation2 + $0x100] sm:$0xff]  ;;  %v138_v8 = vld [vmem:[#allocation2 + $0x1b8] sm:$0xff] }
  0x24   :  { %242 = vmatpush.msra.mxu2 %v155_v40  ;;  %v1164_v63 = vld [vmem:[%s1423_s0 + $0x8] sm:$0xff]  ;;  %265 = vmatpush.msra.mxu3 %v92_v3  ;;  %v172_v9 = vld [vmem:[#allocation2 + $0x2c8] sm:$0xff]  ;;  %v80_v10 = vld [vmem:[%s1423_s0 + $0x18] sm:$0xff] }
  0x25   :  { %219 = vmatpush.msra.mxu1 %v123_v41  ;;  %197 = vmatpush.msra.mxu0 %v89_v43  ;;  %v1170_v7 = vld [vmem:[%s1423_s0 + $0x28] sm:$0xff]  ;;  %v136_v11 = vld [vmem:[#allocation2 + $0x1a8] sm:$0xff]  ;;  %v170_v13 = vld [vmem:[#allocation2 + $0x2b8] sm:$0xff] }
  0x26   :  { %243 = vmatpush.msra.mxu2 %v153_v44  ;;  %266 = vmatpush.msra.mxu3 %v90_v6  ;;  %v88_v12 = vld [vmem:[#allocation2 + $0x28] sm:$0xff]  ;;  %v81_v14 = vld [vmem:[%s1423_s0 + $0x20] sm:$0xff]  ;;  %v375_v38 = vld [vmem:[%s1426_s3 + $0x78] sm:$0xff] }
  0x27   :  { %220 = vmatpush.msra.mxu1 %v121_v45  ;;  %198 = vmatpush.msra.mxu0 %v87_v47  ;;  %v134_v15 = vld [vmem:[#allocation2 + $0x198] sm:$0xff]  ;;  %v168_v16 = vld [vmem:[#allocation2 + $0x2a8] sm:$0xff]  ;;  %v373_v40 = vld [vmem:[%s1426_s3 + $0x68] sm:$0xff] }
  0x28   :  { %244 = vmatpush.msra.mxu2 %v151_v48  ;;  %267 = vmatpush.msra.mxu3 %v88_v12  ;;  %v86_v17 = vld [vmem:[#allocation2 + $0x18] sm:$0xff]  ;;  %v132_v18 = vld [vmem:[#allocation2 + $0x188] sm:$0xff]  ;;  %v371_v42 = vld [vmem:[%s1426_s3 + $0x58] sm:$0xff] }
  0x29   :  { %221 = vmatpush.msra.mxu1 %v119_v49  ;;  %199 = vmatpush.msra.mxu0 %v85_v51  ;;  %v166_v19 = vld [vmem:[#allocation2 + $0x298] sm:$0xff]  ;;  %v84_v20 = vld [vmem:[#allocation2 + $0x8] sm:$0xff]  ;;  %v369_v44 = vld [vmem:[%s1426_s3 + $0x48] sm:$0xff] }
  0x2a   :  { %245 = vmatpush.msra.mxu2 %v149_v52  ;;  %v130_v21 = vld [vmem:[#allocation2 + $0x178] sm:$0xff]  ;;  %268 = vmatpush.msra.mxu3 %v86_v17  ;;  %v164_v22 = vld [vmem:[#allocation2 + $0x288] sm:$0xff]  ;;  %v367_v46 = vld [vmem:[%s1426_s3 + $0x38] sm:$0xff] }
  0x2b   :  { %222 = vmatpush.msra.mxu1 %v117_v53  ;;  %200 = vmatpush.msra.mxu0 %v83_v55  ;;  %v128_v23 = vld [vmem:[#allocation2 + $0x168] sm:$0xff]  ;;  %v162_v24 = vld [vmem:[#allocation2 + $0x278] sm:$0xff]  ;;  %v365_v48 = vld [vmem:[%s1426_s3 + $0x28] sm:$0xff] }
  0x2c   :  { %246 = vmatpush.msra.mxu2 %v147_v56  ;;  %201 = vmatmul.f32.vlgmr.msra.gmra.mxu0 %v77_v60  ;;  %v126_v25 = vld [vmem:[#allocation2 + $0x158] sm:$0xff]  ;;  %v160_v26 = vld [vmem:[#allocation2 + $0x268] sm:$0xff]  ;;  %v363_v50 = vld [vmem:[%s1426_s3 + $0x18] sm:$0xff] }
  0x2d   :  { %247 = vmatmul.f32.vlgmr.msra.gmra.mxu2 %v1155_v57  ;;  %277 = vmatpush.msrb.mxu0 %v146_v58  ;;  %v124_v27 = vld [vmem:[#allocation2 + $0x148] sm:$0xff]  ;;  %v158_v28 = vld [vmem:[#allocation2 + $0x258] sm:$0xff]  ;;  %v391_v54 = vld [vmem:[%s1426_s3 + $0xf8] sm:$0xff] }
  0x2e   :  { %223 = vmatpush.msra.mxu1 %v115_v59  ;;  %269 = vmatpush.msra.mxu3 %v84_v20  ;;  %v122_v29 = vld [vmem:[#allocation2 + $0x138] sm:$0xff]  ;;  %v156_v30 = vld [vmem:[#allocation2 + $0x248] sm:$0xff]  ;;  %v361_v56 = vld [vmem:[%s1426_s3 + $0x8] sm:$0xff] }
  0x2f   :  { %278 = vmatpush.msrb.mxu0 %v144_v61  ;;  %224 = vmatmul.f32.vlgmr.msra.gmra.mxu1 %v1164_v63  ;;  %v120_v31 = vld [vmem:[#allocation2 + $0x128] sm:$0xff]  ;;  %v154_v32 = vld [vmem:[#allocation2 + $0x238] sm:$0xff]  ;;  %v389_v61 = vld [vmem:[%s1426_s3 + $0xe8] sm:$0xff] }
  0x30   :  { %300 = vmatpush.msrb.mxu1 %v178_v62  ;;  %270 = vmatmul.f32.vlgmr.msra.gmra.mxu3 %v77_v60  ;;  %v118_v33 = vld [vmem:[#allocation2 + $0x118] sm:$0xff]  ;;  %v152_v34 = vld [vmem:[#allocation2 + $0x228] sm:$0xff]  ;;  %vm966_vm8 = vmneg %vm355_vm0 }
  0x31   :  { %279 = vmatpush.msrb.mxu0 %v142_v1  ;;  %v116_v35 = vld [vmem:[#allocation2 + $0x108] sm:$0xff]  ;;  %v150_v36 = vld [vmem:[#allocation2 + $0x218] sm:$0xff]  ;;  %392 = vmatpush.msrb.mxu2 %v375_v38  ;;  %v387_v1 = vld [vmem:[%s1426_s3 + $0xd8] sm:$0xff] }
  0x32   :  { %301 = vmatpush.msrb.mxu1 %v176_v2  ;;  %v148_v37 = vld [vmem:[#allocation2 + $0x208] sm:$0xff]  ;;  %v372_v41 = vld [vmem:[%s1426_s3 + $0x60] sm:$0xff]  ;;  %412 = vmatpush.msrb.mxu3 %v391_v54 }
  0x33   :  { %280 = vmatpush.msrb.mxu0 %v140_v4  ;;  %v374_v39 = vld [vmem:[%s1426_s3 + $0x70] sm:$0xff]  ;;  %v368_v45 = vld [vmem:[%s1426_s3 + $0x40] sm:$0xff] }
  0x34   :  { %302 = vmatpush.msrb.mxu1 %v174_v5  ;;  %204 = vmatmul.f32.gmra.mxu0 %v80_v10  ;;  %v370_v43 = vld [vmem:[%s1426_s3 + $0x50] sm:$0xff]  ;;  %v364_v49 = vld [vmem:[%s1426_s3 + $0x20] sm:$0xff] }
  0x35   :  { %250 = vmatmul.f32.gmra.mxu2 %v1170_v7  ;;  %281 = vmatpush.msrb.mxu0 %v138_v8  ;;  %v366_v47 = vld [vmem:[%s1426_s3 + $0x30] sm:$0xff]  ;;  %v1224_v51 = vld [vmem:[%s1430_s7] sm:$0x3] }
  0x36   :  { %303 = vmatpush.msrb.mxu1 %v172_v9  ;;  %393 = vmatpush.msrb.mxu2 %v374_v39  ;;  %v181_v52 = vperm.slane %v1224_v51, 0  ;;  %v362_v53 = vld [vmem:[%s1426_s3 + $0x10] sm:$0xff]  ;;  %v360_v60 = vld [vmem:[%s1426_s3] sm:$0xff] }
  0x37   :  { %282 = vmatpush.msrb.mxu0 %v136_v11  ;;  %227 = vmatmul.f32.gmra.mxu1 %v81_v14  ;;  %v388_v62 = vld [vmem:[%s1426_s3 + $0xe0] sm:$0xff]  ;;  %v386_v4 = vld [vmem:[%s1426_s3 + $0xd0] sm:$0xff] }
  0x38   :  { %304 = vmatpush.msrb.mxu1 %v170_v13  ;;  %273 = vmatmul.f32.gmra.mxu3 %v80_v10  ;;  %v384_v10 = vld [vmem:[%s1426_s3 + $0xc0] sm:$0xff]  ;;  %v383_v13 = vld [vmem:[%s1426_s3 + $0xb8] sm:$0xff] }
  0x39   :  { %283 = vmatpush.msrb.mxu0 %v134_v15  ;;  %394 = vmatpush.msrb.mxu2 %v373_v40 }
  0x3a   :  { %305 = vmatpush.msrb.mxu1 %v168_v16  ;;  %v382_v16 = vld [vmem:[%s1426_s3 + $0xb0] sm:$0xff] }
  0x3b   :  { %284 = vmatpush.msrb.mxu0 %v132_v18  ;;  %395 = vmatpush.msrb.mxu2 %v372_v41 }
  0x3c   :  { %306 = vmatpush.msrb.mxu1 %v166_v19  ;;  %v381_v19 = vld [vmem:[%s1426_s3 + $0xa8] sm:$0xff] }
  0x3d   :  { %285 = vmatpush.msrb.mxu0 %v130_v21  ;;  %396 = vmatpush.msrb.mxu2 %v371_v42 }
  0x3e   :  { %307 = vmatpush.msrb.mxu1 %v164_v22  ;;  %v380_v22 = vld [vmem:[%s1426_s3 + $0xa0] sm:$0xff] }
  0x3f   :  { %286 = vmatpush.msrb.mxu0 %v128_v23  ;;  %397 = vmatpush.msrb.mxu2 %v370_v43  ;;  %v379_v23 = vld [vmem:[%s1426_s3 + $0x98] sm:$0xff] }
  0x40   :  { %308 = vmatpush.msrb.mxu1 %v162_v24 }
  0x41   :  { %287 = vmatpush.msrb.mxu0 %v126_v25  ;;  %398 = vmatpush.msrb.mxu2 %v369_v44 }
  0x42   :  { %309 = vmatpush.msrb.mxu1 %v160_v26 }
  0x43   :  { %288 = vmatpush.msrb.mxu0 %v124_v27  ;;  %399 = vmatpush.msrb.mxu2 %v368_v45  ;;  %v378_v27 = vld [vmem:[%s1426_s3 + $0x90] sm:$0xff] }
  0x44   :  { %310 = vmatpush.msrb.mxu1 %v158_v28 }
  0x45   :  { %289 = vmatpush.msrb.mxu0 %v122_v29  ;;  %400 = vmatpush.msrb.mxu2 %v367_v46 }
  0x46   :  { %311 = vmatpush.msrb.mxu1 %v156_v30  ;;  %v377_v30 = vld [vmem:[%s1426_s3 + $0x88] sm:$0xff] }
  0x47   :  { %290 = vmatpush.msrb.mxu0 %v120_v31  ;;  %401 = vmatpush.msrb.mxu2 %v366_v47 }
  0x48   :  { %312 = vmatpush.msrb.mxu1 %v154_v32 }
  0x49   :  { %291 = vmatpush.msrb.mxu0 %v118_v33  ;;  %402 = vmatpush.msrb.mxu2 %v365_v48  ;;  %v376_v33 = vld [vmem:[%s1426_s3 + $0x80] sm:$0xff] }
  0x4a   :  { %313 = vmatpush.msrb.mxu1 %v152_v34  ;;  %v182_v34 = vperm.slane %v1224_v51, 1 }
  0x4b   :  { %292 = vmatpush.msrb.mxu0 %v116_v35  ;;  %403 = vmatpush.msrb.mxu2 %v364_v49 }
  0x4c   :  { %314 = vmatpush.msrb.mxu1 %v150_v36  ;;  %293 = vmatmul.f32.vlgmr.msrb.gmra.mxu0 %v1164_v63 }
  0x4d   :  { %404 = vmatpush.msrb.mxu2 %v363_v50 }
  0x4e   :  { %315 = vmatpush.msrb.mxu1 %v148_v37 }
  0x4f   :  { %316 = vmatmul.f32.vlgmr.msrb.gmra.mxu1 %v1155_v57  ;;  %405 = vmatpush.msrb.mxu2 %v362_v53  ;;  %v390_v57 = vld [vmem:[%s1426_s3 + $0xf0] sm:$0xff] }
  0x50   :  { %413 = vmatpush.msrb.mxu3 %v390_v57 }
  0x51   :  { %406 = vmatpush.msrb.mxu2 %v361_v56 }
  0x52   :  { %414 = vmatpush.msrb.mxu3 %v389_v61 }
  0x53   :  { %407 = vmatpush.msrb.mxu2 %v360_v60 }
  0x54   :  { %296 = vmatmul.f32.gmra.mxu0 %v81_v14  ;;  %415 = vmatpush.msrb.mxu3 %v388_v62 }
  0x56   :  { %416 = vmatpush.msrb.mxu3 %v387_v1 }
  0x57   :  { %319 = vmatmul.f32.gmra.mxu1 %v1170_v7  ;;  %v385_v7 = vld [vmem:[%s1426_s3 + $0xc8] sm:$0xff] }
  0x58   :  { %417 = vmatpush.msrb.mxu3 %v386_v4 }
  0x5a   :  { %418 = vmatpush.msrb.mxu3 %v385_v7  ;;  %v433_v7 = vld [vmem:[%s1427_s4 + $0x8] sm:$0xff] }
  0x5c   :  { %419 = vmatpush.msrb.mxu3 %v384_v10 }
  0x5e   :  { %420 = vmatpush.msrb.mxu3 %v383_v13  ;;  %v610_v13 = vld [vmem:[#allocation5 + $0xf8] sm:$0xff] }
  0x5f   :  { %702 = vmatpush.msra.mxu1 %v610_v13  ;;  %v633_v13 = vld [vmem:[#allocation5 + $0x1b0] sm:$0xff] }
  0x60   :  { %421 = vmatpush.msrb.mxu3 %v382_v16  ;;  %v592_v16 = vld [vmem:[#allocation5 + $0x68] sm:$0xff] }
  0x62   :  { %422 = vmatpush.msrb.mxu3 %v381_v19  ;;  %v607_v19 = vld [vmem:[#allocation5 + $0xe0] sm:$0xff] }
  0x64   :  { %423 = vmatpush.msrb.mxu3 %v380_v22  ;;  %v589_v22 = vld [vmem:[#allocation5 + $0x50] sm:$0xff] }
  0x66   :  { %424 = vmatpush.msrb.mxu3 %v379_v23  ;;  %v605_v23 = vld [vmem:[#allocation5 + $0xd0] sm:$0xff] }
  0x68   :  { %425 = vmatpush.msrb.mxu3 %v378_v27  ;;  %v642_v27 = vld [vmem:[#allocation5 + $0x1f8] sm:$0xff] }
  0x6a   :  { %426 = vmatpush.msrb.mxu3 %v377_v30  ;;  %v625_v30 = vld [vmem:[#allocation5 + $0x170] sm:$0xff] }
  0x6c   :  { %427 = vmatpush.msrb.mxu3 %v376_v33  ;;  %v602_v33 = vld [vmem:[#allocation5 + $0xb8] sm:$0xff] }
  0x6e   :  { %473 = vmatpush.msra.mxu3 %v433_v7  ;;  %v579_v7 = vld [vmem:[#allocation5] sm:$0xff] }
  0xa9   :  { %v202_v55 = vpop.f32.mrf.mxu0 }
  0xaa   :  { %v203_v58 = vadd.f32 %v202_v55, %v181_v52 }
  0xac   :  { %v225_v59 = vpop.f32.mrf.mxu1 }
  0xad   :  { %v226_v0 = vadd.f32 %v225_v59, %v203_v58 }
  0xb0   :  { %v248_v63 = vpop.f32.mrf.mxu2 }
  0xb1   :  { %v205_v2 = vpop.f32.mrf.mxu0  ;;  %v1254_v5 = vadd.f32 %v248_v63, %v226_v0 }
  0xb2   :  { %v206_v3 = vadd.f32 %v205_v2, %v181_v52 }
  0xb3   :  { %v337_v11 = vmul.f32 %v1254_v5, %v1254_v5  ;;  %v271_v26 = vpop.f32.mrf.mxu3 }
  0xb4   :  { %v228_v6 = vpop.f32.mrf.mxu1  ;;  %v272_v39 = vadd.f32 %v271_v26, %v182_v34  ;;  %v626_v26 = vld [vmem:[#allocation5 + $0x178] sm:$0xff] }
  0xb5   :  { %v229_v8 = vadd.f32 %v228_v6, %v206_v3  ;;  %v432_v6 = vld [vmem:[%s1427_s4] sm:$0xff] }
  0xb6   :  { %453 = vmatpush.msra.mxu2 %v432_v6  ;;  %v634_v6 = vld [vmem:[#allocation5 + $0x1b8] sm:$0xff] }
  0xb8   :  { %v251_v9 = vpop.f32.mrf.mxu2 }
  0xb9   :  { %v1264_v12 = vadd.f32 %v251_v9, %v229_v8 }
  0xbb   :  { %v323_v14 = vadd.f32 %v1264_v12, %v1254_v5  ;;  %v339_v15 = vmul.f32 %v1264_v12, %v1264_v12  ;;  %v274_v41 = vpop.f32.mrf.mxu3 }
  0xbc   :  { %v275_v44 = vadd.f32 %v274_v41, %v182_v34  ;;  %v624_v34 = vld [vmem:[#allocation5 + $0x168] sm:$0xff] }
  0xbd   :  { %v324_v17 = vrot.slane %v323_v14, 4  ;;  %v341_v18 = vadd.f32 %v339_v15, %v337_v11  ;;  %v594_v11 = vld [vmem:[#allocation5 + $0x78] sm:$0xff]  ;;  %v609_v15 = vld [vmem:[#allocation5 + $0xf0] sm:$0xff]  ;;  %v600_v41 = vld [vmem:[#allocation5 + $0xa8] sm:$0xff] }
  0xbe   :  { %679 = vmatpush.msra.mxu0 %v594_v11  ;;  %703 = vmatpush.msra.mxu1 %v609_v15  ;;  %v617_v11 = vld [vmem:[#allocation5 + $0x130] sm:$0xff]  ;;  %v674_v15 = vld [vmem:[#allocation5 + $0x2f8] sm:$0xff] }
  0xbf   :  { %v325_v20 = vadd.f32 %v324_v17, %v323_v14  ;;  %v342_v21 = vrot.slane %v341_v18, 4  ;;  %v593_v14 = vld [vmem:[#allocation5 + $0x70] sm:$0xff]  ;;  %v608_v17 = vld [vmem:[#allocation5 + $0xe8] sm:$0xff] }
  0xc0   :  { %680 = vmatpush.msra.mxu0 %v593_v14  ;;  %704 = vmatpush.msra.mxu1 %v608_v17  ;;  %v658_v14 = vld [vmem:[#allocation5 + $0x278] sm:$0xff]  ;;  %v632_v17 = vld [vmem:[#allocation5 + $0x1a8] sm:$0xff] }
  0xc1   :  { %v326_v24 = vrot.slane %v325_v20, 2  ;;  %v343_v25 = vadd.f32 %v342_v21, %v341_v18  ;;  %v591_v18 = vld [vmem:[#allocation5 + $0x60] sm:$0xff]  ;;  %v606_v21 = vld [vmem:[#allocation5 + $0xd8] sm:$0xff] }
  0xc2   :  { %681 = vmatpush.msra.mxu0 %v592_v16  ;;  %705 = vmatpush.msra.mxu1 %v607_v19  ;;  %v616_v16 = vld [vmem:[#allocation5 + $0x128] sm:$0xff]  ;;  %v673_v19 = vld [vmem:[#allocation5 + $0x2f0] sm:$0xff] }
  0xc3   :  { %v327_v28 = vadd.f32 %v326_v24, %v325_v20  ;;  %v344_v29 = vrot.slane %v343_v25, 2  ;;  %v590_v20 = vld [vmem:[#allocation5 + $0x58] sm:$0xff]  ;;  %v588_v24 = vld [vmem:[#allocation5 + $0x48] sm:$0xff] }
  0xc4   :  { %682 = vmatpush.msra.mxu0 %v591_v18  ;;  %706 = vmatpush.msra.mxu1 %v606_v21  ;;  %v657_v18 = vld [vmem:[#allocation5 + $0x270] sm:$0xff]  ;;  %v631_v21 = vld [vmem:[#allocation5 + $0x1a0] sm:$0xff] }
  0xc5   :  { %v328_v31 = vrot.slane %v327_v28, 1  ;;  %v345_v32 = vadd.f32 %v344_v29, %v343_v25  ;;  %v604_v25 = vld [vmem:[#allocation5 + $0xc8] sm:$0xff]  ;;  %v603_v29 = vld [vmem:[#allocation5 + $0xc0] sm:$0xff] }
  0xc6   :  { %683 = vmatpush.msra.mxu0 %v590_v20  ;;  %707 = vmatpush.msra.mxu1 %v605_v23  ;;  %v615_v20 = vld [vmem:[#allocation5 + $0x120] sm:$0xff]  ;;  %v672_v23 = vld [vmem:[#allocation5 + $0x2e8] sm:$0xff] }
  0xc7   :  { %v346_v35 = vrot.slane %v345_v32, 1  ;;  %v329_v37 = vadd.f32 %v328_v31, %v327_v28  ;;  %v587_v28 = vld [vmem:[#allocation5 + $0x40] sm:$0xff]  ;;  %v641_v31 = vld [vmem:[#allocation5 + $0x1f0] sm:$0xff] }
  0xc8   :  { %684 = vmatpush.msra.mxu0 %v589_v22  ;;  %708 = vmatpush.msra.mxu1 %v604_v25  ;;  %v656_v22 = vld [vmem:[#allocation5 + $0x268] sm:$0xff]  ;;  %v630_v25 = vld [vmem:[#allocation5 + $0x198] sm:$0xff] }
  0xc9   :  { %v294_v36 = vpop.f32.mrf.mxu0  ;;  %v347_v38 = vadd.f32 %v346_v35, %v345_v32  ;;  %v586_v32 = vld [vmem:[#allocation5 + $0x38] sm:$0xff]  ;;  %v640_v35 = vld [vmem:[#allocation5 + $0x1e8] sm:$0xff] }
  0xca   :  { %v295_v45 = vadd.f32 %v294_v36, %v272_v39  ;;  %685 = vmatpush.msra.mxu0 %v588_v24  ;;  %709 = vmatpush.msra.mxu1 %v603_v29  ;;  %v585_v36 = vld [vmem:[#allocation5 + $0x30] sm:$0xff]  ;;  %v639_v39 = vld [vmem:[#allocation5 + $0x1e0] sm:$0xff]  ;;  %v614_v24 = vld [vmem:[#allocation5 + $0x118] sm:$0xff] }
  0xcb   :  { %v356_v40 = vsel %vm355_vm0, %v329_v37, %v347_v38  ;;  %v601_v37 = vld [vmem:[#allocation5 + $0xb0] sm:$0xff]  ;;  %v623_v38 = vld [vmem:[#allocation5 + $0x160] sm:$0xff] }
  0xcc   :  { %v317_v42 = vpop.f32.mrf.mxu1  ;;  %v358_v43 = vmul.f32 0.001953125, %v356_v40  ;;  %686 = vmatpush.msra.mxu0 %v587_v28  ;;  %710 = vmatpush.msra.mxu1 %v602_v33  ;;  %v584_v40 = vld [vmem:[#allocation5 + $0x28] sm:$0xff]  ;;  %v613_v28 = vld [vmem:[#allocation5 + $0x110] sm:$0xff] }
  0xcd   :  { %v1296_v48 = vadd.f32 %v317_v42, %v295_v45  ;;  %v622_v42 = vld [vmem:[#allocation5 + $0x158] sm:$0xff]  ;;  %v599_v45 = vld [vmem:[#allocation5 + $0xa0] sm:$0xff]  ;;  %v629_v29 = vld [vmem:[#allocation5 + $0x190] sm:$0xff] }
  0xce   :  { %408 = vmatmul.f32.vlgmr.msrb.gmra.mxu2 %v358_v43  ;;  %687 = vmatpush.msra.mxu0 %v586_v32  ;;  %v638_v43 = vld [vmem:[#allocation5 + $0x1d8] sm:$0xff]  ;;  %v612_v33 = vld [vmem:[#allocation5 + $0x108] sm:$0xff] }
  0xcf   :  { %v338_v51 = vmul.f32 %v1296_v48, %v1296_v48  ;;  %725 = vmatpush.msrb.mxu2 %v626_v26  ;;  %711 = vmatpush.msra.mxu1 %v601_v37  ;;  %v655_v26 = vld [vmem:[#allocation5 + $0x260] sm:$0xff]  ;;  %v670_v32 = vld [vmem:[#allocation5 + $0x2d8] sm:$0xff]  ;;  %v653_v37 = vld [vmem:[#allocation5 + $0x250] sm:$0xff] }
  0xd0   :  { %688 = vmatpush.msra.mxu0 %v585_v36  ;;  %v628_v36 = vld [vmem:[#allocation5 + $0x188] sm:$0xff] }
  0xd1   :  { %v297_v46 = vpop.f32.mrf.mxu0  ;;  %726 = vmatpush.msrb.mxu2 %v625_v30  ;;  %712 = vmatpush.msra.mxu1 %v600_v41  ;;  %v627_v41 = vld [vmem:[#allocation5 + $0x180] sm:$0xff] }
  0xd2   :  { %v298_v47 = vadd.f32 %v297_v46, %v275_v44  ;;  %689 = vmatpush.msra.mxu0 %v584_v40  ;;  %v583_v44 = vld [vmem:[#allocation5 + $0x20] sm:$0xff]  ;;  %v621_v46 = vld [vmem:[#allocation5 + $0x150] sm:$0xff] }
  0xd3   :  { %727 = vmatpush.msrb.mxu2 %v624_v34  ;;  %713 = vmatpush.msra.mxu1 %v599_v45  ;;  %v611_v40 = vld [vmem:[#allocation5 + $0x100] sm:$0xff] }
  0xd4   :  { %v320_v49 = vpop.f32.mrf.mxu1  ;;  %690 = vmatpush.msra.mxu0 %v583_v44  ;;  %v668_v44 = vld [vmem:[#allocation5 + $0x2c8] sm:$0xff] }
  0xd5   :  { %v1298_v50 = vadd.f32 %v320_v49, %v298_v47  ;;  %728 = vmatpush.msrb.mxu2 %v623_v38  ;;  %v637_v47 = vld [vmem:[#allocation5 + $0x1d0] sm:$0xff] }
  0xd6   :  { %v669_v38 = vld [vmem:[#allocation5 + $0x2d0] sm:$0xff] }
  0xd7   :  { %v330_v52 = vadd.f32 %v1298_v50, %v1296_v48  ;;  %v340_v53 = vmul.f32 %v1298_v50, %v1298_v50  ;;  %729 = vmatpush.msrb.mxu2 %v622_v42 }
  0xd9   :  { %v331_v54 = vrot.slane %v330_v52, 4  ;;  %v348_v55 = vadd.f32 %v340_v53, %v338_v51  ;;  %730 = vmatpush.msrb.mxu2 %v621_v46  ;;  %v598_v53 = vld [vmem:[#allocation5 + $0x98] sm:$0xff] }
  0xda   :  { %714 = vmatpush.msra.mxu1 %v598_v53  ;;  %v667_v53 = vld [vmem:[#allocation5 + $0x2c0] sm:$0xff] }
  0xdb   :  { %v332_v56 = vadd.f32 %v331_v54, %v330_v52  ;;  %v349_v57 = vrot.slane %v348_v55, 4  ;;  %v582_v52 = vld [vmem:[#allocation5 + $0x18] sm:$0xff] }
  0xdc   :  { %691 = vmatpush.msra.mxu0 %v582_v52  ;;  %v651_v52 = vld [vmem:[#allocation5 + $0x240] sm:$0xff] }
  0xdd   :  { %v333_v58 = vrot.slane %v332_v56, 2  ;;  %v350_v59 = vadd.f32 %v349_v57, %v348_v55  ;;  %v636_v57 = vld [vmem:[#allocation5 + $0x1c8] sm:$0xff] }
  0xdf   :  { %v334_v60 = vadd.f32 %v333_v58, %v332_v56  ;;  %v351_v61 = vrot.slane %v350_v59, 2  ;;  %v620_v56 = vld [vmem:[#allocation5 + $0x148] sm:$0xff]  ;;  %v581_v58 = vld [vmem:[#allocation5 + $0x10] sm:$0xff] }
  0xe0   :  { %731 = vmatpush.msrb.mxu2 %v620_v56  ;;  %692 = vmatpush.msra.mxu0 %v581_v58  ;;  %v650_v56 = vld [vmem:[#allocation5 + $0x238] sm:$0xff] }
  0xe1   :  { %v335_v62 = vrot.slane %v334_v60, 1  ;;  %v352_v63 = vadd.f32 %v351_v61, %v350_v59  ;;  %v597_v59 = vld [vmem:[#allocation5 + $0x90] sm:$0xff] }
  0xe2   :  { %715 = vmatpush.msra.mxu1 %v597_v59  ;;  %v649_v59 = vld [vmem:[#allocation5 + $0x230] sm:$0xff] }
  0xe3   :  { %v353_v0 = vrot.slane %v352_v63, 1  ;;  %v336_v1 = vadd.f32 %v335_v62, %v334_v60  ;;  %v619_v62 = vld [vmem:[#allocation5 + $0x140] sm:$0xff] }
  0xe4   :  { %732 = vmatpush.msrb.mxu2 %v619_v62 }
  0xe5   :  { %v354_v2 = vadd.f32 %v353_v0, %v352_v63  ;;  %v635_v63 = vld [vmem:[#allocation5 + $0x1c0] sm:$0xff]  ;;  %v580_v0 = vld [vmem:[#allocation5 + $0x8] sm:$0xff] }
  0xe6   :  { %693 = vmatpush.msra.mxu0 %v580_v0  ;;  %v664_v0 = vld [vmem:[#allocation5 + $0x2a8] sm:$0xff] }
  0xe7   :  { %v357_v3 = vsel %vm355_vm0, %v336_v1, %v354_v2  ;;  %v596_v1 = vld [vmem:[#allocation5 + $0x88] sm:$0xff] }
  0xe8   :  { %v359_v4 = vmul.f32 0.001953125, %v357_v3  ;;  %716 = vmatpush.msra.mxu1 %v596_v1  ;;  %694 = vmatpush.msra.mxu0 %v579_v7  ;;  %v645_v7 = vld [vmem:[#allocation5 + $0x210] sm:$0xff] }
  0xea   :  { %428 = vmatmul.f32.vlgmr.msrb.gmra.mxu3 %v359_v4  ;;  %v618_v4 = vld [vmem:[#allocation5 + $0x138] sm:$0xff]  ;;  %771 = vmatpush.msrb.mxu0 %v658_v14 }
  0xeb   :  { %748 = vmatpush.msrb.mxu3 %v642_v27  ;;  %733 = vmatpush.msrb.mxu2 %v618_v4  ;;  %v671_v27 = vld [vmem:[#allocation5 + $0x2e0] sm:$0xff]  ;;  %v646_v4 = vld [vmem:[#allocation5 + $0x218] sm:$0xff] }
  0xec   :  { %772 = vmatpush.msrb.mxu0 %v657_v18 }
  0xed   :  { %749 = vmatpush.msrb.mxu3 %v641_v31  ;;  %734 = vmatpush.msrb.mxu2 %v617_v11  ;;  %v654_v31 = vld [vmem:[#allocation5 + $0x258] sm:$0xff]  ;;  %v660_v11 = vld [vmem:[#allocation5 + $0x288] sm:$0xff] }
  0xee   :  { %773 = vmatpush.msrb.mxu0 %v656_v22 }
  0xef   :  { %750 = vmatpush.msrb.mxu3 %v640_v35  ;;  %735 = vmatpush.msrb.mxu2 %v616_v16  ;;  %v659_v16 = vld [vmem:[#allocation5 + $0x280] sm:$0xff] }
  0xf0   :  { %774 = vmatpush.msrb.mxu0 %v655_v26 }
  0xf1   :  { %751 = vmatpush.msrb.mxu3 %v639_v39  ;;  %736 = vmatpush.msrb.mxu2 %v615_v20  ;;  %v519_v20 = vld [vmem:[%s1432_s9] sm:$0x3] }
  0xf2   :  { %775 = vmatpush.msrb.mxu0 %v654_v31 }
  0xf3   :  { %752 = vmatpush.msrb.mxu3 %v638_v43  ;;  %737 = vmatpush.msrb.mxu2 %v614_v24  ;;  %v652_v43 = vld [vmem:[#allocation5 + $0x248] sm:$0xff] }
  0xf4   :  { %776 = vmatpush.msrb.mxu0 %v653_v37 }
  0xf5   :  { %753 = vmatpush.msrb.mxu3 %v637_v47  ;;  %738 = vmatpush.msrb.mxu2 %v613_v28 }
  0xf6   :  { %777 = vmatpush.msrb.mxu0 %v652_v43 }
  0xf7   :  { %754 = vmatpush.msrb.mxu3 %v636_v57  ;;  %739 = vmatpush.msrb.mxu2 %v612_v33  ;;  %v666_v57 = vld [vmem:[#allocation5 + $0x2b8] sm:$0xff] }
  0xf8   :  { %778 = vmatpush.msrb.mxu0 %v651_v52  ;;  %v847_v52 = vld [vmem:[%s1428_s5 + $0x60] sm:$0xff] }
  0xf9   :  { %755 = vmatpush.msrb.mxu3 %v635_v63  ;;  %740 = vmatpush.msrb.mxu2 %v611_v40  ;;  %v648_v63 = vld [vmem:[#allocation5 + $0x228] sm:$0xff] }
  0xfa   :  { %779 = vmatpush.msrb.mxu0 %v650_v56  ;;  %v843_v56 = vld [vmem:[%s1428_s5 + $0x40] sm:$0xff] }
  0xfb   :  { %756 = vmatpush.msrb.mxu3 %v634_v6  ;;  %v662_v6 = vld [vmem:[#allocation5 + $0x298] sm:$0xff] }
  0xfc   :  { %780 = vmatpush.msrb.mxu0 %v649_v59  ;;  %v842_v59 = vld [vmem:[%s1428_s5 + $0x38] sm:$0xff] }
  0xfd   :  { %757 = vmatpush.msrb.mxu3 %v633_v13 }
  0xfe   :  { %781 = vmatpush.msrb.mxu0 %v648_v63  ;;  %v840_v63 = vld [vmem:[%s1428_s5 + $0x28] sm:$0xff] }
  0xff   :  { %758 = vmatpush.msrb.mxu3 %v632_v17 }
 0x101   :  { %759 = vmatpush.msrb.mxu3 %v631_v21 }
 0x103   :  { %760 = vmatpush.msrb.mxu3 %v630_v25 }
 0x105   :  { %761 = vmatpush.msrb.mxu3 %v629_v29 }
 0x107   :  { %762 = vmatpush.msrb.mxu3 %v628_v36 }
 0x109   :  { %763 = vmatpush.msrb.mxu3 %v627_v41 }
 0x151   :  { %v409_v8 = vpop.f32.mrf.mxu2 }
 0x16d   :  { %v429_v9 = vpop.f32.mrf.mxu3 }
 0x16e   :  { %v430_v10 = vadd.f32 %v429_v9, %v409_v8  ;;  %v595_v8 = vld [vmem:[#allocation5 + $0x80] sm:$0xff] }
 0x16f   :  { %717 = vmatpush.msra.mxu1 %v595_v8  ;;  %v661_v8 = vld [vmem:[#allocation5 + $0x290] sm:$0xff] }
 0x170   :  { %964 = vmatmul.msk.f32.vlgmr.msra.gmra.mxu2 %vm434_vm1, %v430_v10  ;;  %965 = vmatmul.msk.f32.vlgmr.msra.gmra.mxu3 %vm434_vm1, %v430_v10 }
 0x171   :  { %794 = vmatpush.msrb.mxu1 %v674_v15  ;;  %v643_v15 = vld [vmem:[#allocation5 + $0x200] sm:$0xff] }
 0x173   :  { %795 = vmatpush.msrb.mxu1 %v673_v19 }
 0x175   :  { %796 = vmatpush.msrb.mxu1 %v672_v23 }
 0x177   :  { %797 = vmatpush.msrb.mxu1 %v671_v27 }
 0x179   :  { %798 = vmatpush.msrb.mxu1 %v670_v32 }
 0x17b   :  { %799 = vmatpush.msrb.mxu1 %v669_v38 }
 0x17d   :  { %800 = vmatpush.msrb.mxu1 %v668_v44 }
 0x17f   :  { %801 = vmatpush.msrb.mxu1 %v667_v53  ;;  %v846_v53 = vld [vmem:[%s1428_s5 + $0x58] sm:$0xff] }
 0x181   :  { %802 = vmatpush.msrb.mxu1 %v666_v57 }
 0x1f3   :  { %v1313_v49 = vpop.f32.mrf.mxu2  ;;  %v1315_v51 = vpop.f32.mrf.mxu3 }
 0x1f4   :  { %v478_v54 = vmul.f32 %v1313_v49, %v1313_v49  ;;  %v479_v55 = vmul.f32 %v1315_v51, %v1315_v51 }
 0x1f6   :  { %v482_v60 = vrot.slane %v478_v54, 7  ;;  %v483_v61 = vrot.slane %v479_v55, 7 }
 0x1f8   :  { %v486_v2 = vsub.f32 %v1313_v49, %v482_v60  ;;  %v487_v3 = vsub.f32 %v1315_v51, %v483_v61  ;;  %v665_v60 = vld [vmem:[#allocation5 + $0x2b0] sm:$0xff] }
 0x1f9   :  { %803 = vmatpush.msrb.mxu1 %v665_v60  ;;  %v981_v60 = vld [vmem:[%s1433_s10] ss:$0 sm:$0xff] }
 0x1fa   :  { %v1323_v9 = vadd.f32 1e-05, %v486_v2  ;;  %v1325_v10 = vadd.f32 1e-05, %v487_v3  ;;  %v647_v2 = vld [vmem:[#allocation5 + $0x220] sm:$0xff] }
 0x1fb   :  { %804 = vmatpush.msrb.mxu1 %v664_v0  ;;  %v663_v3 = vld [vmem:[#allocation5 + $0x2a0] sm:$0xff]  ;;  %782 = vmatpush.msrb.mxu0 %v647_v2 }
 0x1fc   :  { %982 = vrsqrt.f32 %v1323_v9  ;;  %vm497_vm4 = vweird.f32 %v1323_v9  ;;  %vm507_vm6 = vweird.f32 %v1325_v10 }
 0x1fd   :  { %984 = vrsqrt.f32 %v1325_v10  ;;  %805 = vmatpush.msrb.mxu1 %v663_v3  ;;  %783 = vmatpush.msrb.mxu0 %v646_v4  ;;  %v838_v4 = vld [vmem:[%s1428_s5 + $0x18] sm:$0xff] }
 0x1ff   :  { %806 = vmatpush.msrb.mxu1 %v662_v6  ;;  %784 = vmatpush.msrb.mxu0 %v645_v7  ;;  %v837_v6 = vld [vmem:[%s1428_s5 + $0x10] sm:$0xff] }
 0x201   :  { %807 = vmatpush.msrb.mxu1 %v661_v8 }
 0x202   :  { %v983_v30 = vpop.eup %982 }
 0x203   :  { %v985_v34 = vpop.eup %984  ;;  %v492_v35 = vmul.f32 %v983_v30, %v1323_v9  ;;  %vm498_vm2 = vweird.f32 %v983_v30  ;;  %v488_v9 = vld [vmem:[%s1431_s8] sm:$0x3]  ;;  %808 = vmatpush.msrb.mxu1 %v660_v11  ;;  %s950_s8 = sshll.u32 %s1436_s13, 4  ;;  %s951_s8 = int_to_ptr.hbm [resolvable:$true] %s950_s8 }
 0x204   :  { %v502_v39 = vmul.f32 %v985_v34, %v1325_v10  ;;  %vm508_vm3 = vweird.f32 %v985_v34  ;;  %vm499_vm5 = vmor %vm497_vm4, %vm498_vm2  ;;  %v644_v10 = vld [vmem:[#allocation5 + $0x208] sm:$0xff]  ;;  %v835_v11 = vld [vmem:[%s1428_s5] sm:$0xff] }
 0x205   :  { %v493_v42 = vmul.f32 %v983_v30, %v492_v35  ;;  %vm509_vm7 = vmor %vm507_vm6, %vm508_vm3  ;;  %785 = vmatpush.msrb.mxu0 %v644_v10  ;;  %809 = vmatpush.msrb.mxu1 %v659_v16 }
 0x206   :  { %v503_v45 = vmul.f32 %v985_v34, %v502_v39 }
 0x207   :  { %v494_v46 = vmul.f32 0.5, %v493_v42  ;;  %786 = vmatpush.msrb.mxu0 %v643_v15 }
 0x208   :  { %v504_v47 = vmul.f32 0.5, %v503_v45  ;;  %v850_v45 = vld [vmem:[%s1428_s5 + $0x78] sm:$0xff] }
 0x209   :  { %v495_v54 = vsub.f32 1.5, %v494_v46  ;;  %851 = vmatpush.msra.mxu2 %v850_v45  ;;  %v849_v46 = vld [vmem:[%s1428_s5 + $0x70] sm:$0xff] }
 0x20a   :  { %v505_v55 = vsub.f32 1.5, %v504_v47  ;;  %v848_v47 = vld [vmem:[%s1428_s5 + $0x68] sm:$0xff] }
 0x20b   :  { %v496_v58 = vmul.f32 %v983_v30, %v495_v54  ;;  %852 = vmatpush.msra.mxu2 %v849_v46  ;;  %v845_v54 = vld [vmem:[%s1428_s5 + $0x50] sm:$0xff] }
 0x20c   :  { %v506_v61 = vmul.f32 %v985_v34, %v505_v55  ;;  %v844_v55 = vld [vmem:[%s1428_s5 + $0x48] sm:$0xff] }
 0x20d   :  { %v500_v62 = vsel %vm499_vm5, %v983_v30, %v496_v58  ;;  %853 = vmatpush.msra.mxu2 %v848_v47 }
 0x20e   :  { %513 = vst [vmem:[#allocation1] sm:$0xff] %v500_v62  ;;  %v510_v1 = vsel %vm509_vm7, %v985_v34, %v506_v61  ;;  %v841_v61 = vld [vmem:[%s1428_s5 + $0x30] sm:$0xff] }
 0x20f   :  { %514 = vst [vmem:[#allocation1 + $0x9] sm:$0xff] %v510_v1  ;;  %854 = vmatpush.msra.mxu2 %v847_v52  ;;  %v839_v1 = vld [vmem:[%s1428_s5 + $0x20] sm:$0xff] }
 0x211   :  { %855 = vmatpush.msra.mxu2 %v846_v53 }
 0x213   :  { %856 = vmatpush.msra.mxu2 %v845_v54 }
 0x215   :  { %857 = vmatpush.msra.mxu2 %v844_v55 }
 0x216   :  { %v516_v13 = vld [vmem:[#allocation1 + $0x1] ss:$9 sm:$0xff] }
 0x217   :  { %v518_v14 = vmul.f32 %v516_v13, %v488_v9  ;;  %858 = vmatpush.msra.mxu2 %v843_v56  ;;  %v836_v9 = vld [vmem:[%s1428_s5 + $0x8] sm:$0xff] }
 0x219   :  { %v521_v17 = vperm.slane %v518_v14, 0  ;;  %v522_v18 = vperm.slane %v518_v14, 1  ;;  %859 = vmatpush.msra.mxu2 %v842_v59 }
 0x21b   :  { %v526_v19 = vmul.f32 %v522_v18, %v1315_v51  ;;  %v525_v21 = vmul.f32 %v521_v17, %v1313_v49  ;;  %v533_v25 = vmul.f32 %v521_v17, %v1254_v5  ;;  %v534_v27 = vmul.f32 %v522_v18, %v1296_v48  ;;  %860 = vmatpush.msra.mxu2 %v841_v61  ;;  %v923_v61 = vld [vmem:[%s1435_s12] sm:$0x1] }
 0x21c   :  { %v535_v29 = vmul.f32 %v521_v17, %v1264_v12  ;;  %v536_v51 = vmul.f32 %v522_v18, %v1298_v50  ;;  %v871_v18 = vld [vmem:[%s1429_s6] sm:$0xf] }
 0x21d   :  { %v529_v22 = vrot.slane %v526_v19, 7  ;;  %861 = vmatpush.msra.mxu2 %v840_v63  ;;  %972 = vmatpush.msk.msra.mxu3 %vm876_vm10, %v871_v18 }
 0x21f   :  { %v530_v23 = vsel %vm355_vm0, %v525_v21, %v529_v22  ;;  %862 = vmatpush.msra.mxu2 %v839_v1 }
 0x220   :  { %v532_v24 = vsub.f32 %v519_v20, %v530_v23 }
 0x221   :  { %863 = vmatpush.msra.mxu2 %v838_v4  ;;  %v936_v4 = vld [vmem:[%s1423_s0 + $0x8] sm:$0xff] }
 0x222   :  { %v538_v26 = vperm.slane %v532_v24, 0  ;;  %v539_v28 = vperm.slane %v532_v24, 1 }
 0x223   :  { %864 = vmatpush.msra.mxu2 %v837_v6  ;;  %v937_v6 = vld [vmem:[%s1423_s0 + $0x20] sm:$0xff] }
 0x224   :  { %v542_v30 = vadd.f32 %v538_v26, %v533_v25  ;;  %v543_v31 = vadd.f32 %v539_v28, %v534_v27  ;;  %v544_v32 = vadd.f32 %v538_v26, %v535_v29  ;;  %v545_v33 = vadd.f32 %v539_v28, %v536_v51 }
 0x225   :  { %865 = vmatpush.msra.mxu2 %v836_v9 }
 0x226   :  { %v546_v34 = vmax.f32 %v542_v30, 0.0  ;;  %v547_v49 = vmax.f32 %v543_v31, 0.0  ;;  %v548_v36 = vmax.f32 %v544_v32, 0.0  ;;  %v549_v37 = vmax.f32 %v545_v33, 0.0 }
 0x227   :  { %866 = vmatpush.msra.mxu2 %v835_v11 }
 0x228   :  { %741 = vmatmul.f32.vlgmr.msrb.gmra.mxu2 %v546_v34  ;;  %764 = vmatmul.f32.vlgmr.msrb.gmra.mxu3 %v547_v49  ;;  %v554_v35 = vrot.slane %v546_v34, 7  ;;  %v555_v5 = vrot.slane %v547_v49, 7  ;;  %v556_v48 = vrot.slane %v548_v36, 7  ;;  %v558_v12 = vrot.slane %v549_v37, 7 }
 0x229   :  { %v567_v39 = vrot.slane %v546_v34, 1  ;;  %v568_v40 = vrot.slane %v548_v36, 1  ;;  %v570_v41 = vrot.slane %v547_v49, 1  ;;  %v571_v42 = vrot.slane %v549_v37, 1 }
 0x22a   :  { %967 = vmatmul.msk.f32.vlgmr.msra.gmra.mxu0 %vm966_vm8, %v554_v35  ;;  %969 = vmatmul.msk.f32.vlgmr.msra.gmra.mxu1 %vm966_vm8, %v555_v5  ;;  %v557_v50 = vsel %vm355_vm0, %v554_v35, %v556_v48  ;;  %v559_v38 = vsel %vm355_vm0, %v555_v5, %v558_v12 }
 0x22b   :  { %v569_v43 = vsel %vm566_vm9, %v567_v39, %v568_v40  ;;  %v572_v44 = vsel %vm566_vm9, %v570_v41, %v571_v42 }
 0x230   :  { %744 = vmatmul.f32.gmra.mxu2 %v548_v36  ;;  %767 = vmatmul.f32.gmra.mxu3 %v549_v37 }
 0x232   :  { %698 = vmatmul.f32.gmra.mxu0 %v557_v50  ;;  %721 = vmatmul.f32.gmra.mxu1 %v559_v38 }
 0x23a   :  { %787 = vmatmul.f32.vlgmr.msrb.gmra.mxu0 %v569_v43  ;;  %810 = vmatmul.f32.vlgmr.msrb.gmra.mxu1 %v572_v44 }
 0x242   :  { %970 = vmatmul.msk.f32.gmra.mxu0 %vm566_vm9, %v568_v40  ;;  %971 = vmatmul.msk.f32.gmra.mxu1 %vm566_vm9, %v571_v42 }
 0x2a7   :  { %v696_v57 = vpop.f32.mrf.mxu0  ;;  %v719_v58 = vpop.f32.mrf.mxu1 }
 0x2a8   :  { %v697_v0 = vadd.f32 %v981_v60, %v696_v57 }
 0x2aa   :  { %v720_v7 = vadd.f32 %v719_v58, %v697_v0  ;;  %v905_v58 = vld [vmem:[%s1434_s11] sm:$0x1]  ;;  %s1072_s11 = smov [#allocation7]  }
 0x2ab   :  { %v742_v62 = vpop.f32.mrf.mxu2  ;;  %v765_v10 = vpop.f32.mrf.mxu3  ;;  %s948_s12 = sshll.u32 %s1072_s11, 4  ;;  %s949_s12 = int_to_ptr.vmem [resolvable:$true] %s948_s12 }
 0x2ac   :  { %v743_v13 = vadd.f32 %v742_v62, %v720_v7 }
 0x2ae   :  { %v766_v19 = vadd.f32 %v765_v10, %v743_v13 }
 0x2af   :  { %v699_v2 = vpop.f32.mrf.mxu0  ;;  %v722_v3 = vpop.f32.mrf.mxu1 }
 0x2b0   :  { %v700_v8 = vadd.f32 %v981_v60, %v699_v2 }
 0x2b2   :  { %v723_v14 = vadd.f32 %v722_v3, %v700_v8 }
 0x2b3   :  { %v745_v15 = vpop.f32.mrf.mxu2  ;;  %v768_v22 = vpop.f32.mrf.mxu3 }
 0x2b4   :  { %v746_v20 = vadd.f32 %v745_v15, %v723_v14 }
 0x2b6   :  { %v769_v23 = vadd.f32 %v768_v22, %v746_v20 }
 0x2b7   :  { %v788_v16 = vpop.f32.mrf.mxu0  ;;  %v811_v17 = vpop.f32.mrf.mxu1 }
 0x2b8   :  { %v789_v21 = vadd.f32 %v788_v16, %v766_v19 }
 0x2ba   :  { %v812_v25 = vadd.f32 %v811_v17, %v789_v21 }
 0x2bc   :  { %v824_v29 = vmul.f32 %v812_v25, %v812_v25 }
 0x2bf   :  { %v791_v24 = vpop.f32.mrf.mxu0  ;;  %v814_v27 = vpop.f32.mrf.mxu1 }
 0x2c0   :  { %v792_v26 = vadd.f32 %v791_v24, %v769_v23 }
 0x2c2   :  { %v815_v28 = vadd.f32 %v814_v27, %v792_v26 }
 0x2c4   :  { %v817_v51 = vadd.f32 %v815_v28, %v812_v25  ;;  %v825_v30 = vmul.f32 %v815_v28, %v815_v28 }
 0x2c6   :  { %v818_v31 = vrot.slane %v817_v51, 4  ;;  %v826_v32 = vadd.f32 %v825_v30, %v824_v29 }
 0x2c8   :  { %v819_v33 = vadd.f32 %v818_v31, %v817_v51  ;;  %v827_v34 = vrot.slane %v826_v32, 4 }
 0x2ca   :  { %v820_v49 = vrot.slane %v819_v33, 2  ;;  %v828_v35 = vadd.f32 %v827_v34, %v826_v32 }
 0x2cc   :  { %v821_v5 = vadd.f32 %v820_v49, %v819_v33  ;;  %v829_v36 = vrot.slane %v828_v35, 2 }
 0x2ce   :  { %v822_v37 = vrot.slane %v821_v5, 1  ;;  %v830_v48 = vadd.f32 %v829_v36, %v828_v35 }
 0x2d0   :  { %v831_v12 = vrot.slane %v830_v48, 1  ;;  %v823_v50 = vadd.f32 %v822_v37, %v821_v5 }
 0x2d2   :  { %v832_v38 = vadd.f32 %v831_v12, %v830_v48 }
 0x2d4   :  { %v833_v39 = vsel %vm355_vm0, %v823_v50, %v832_v38 }
 0x2d5   :  { %v834_v40 = vmul.f32 0.001953125, %v833_v39 }
 0x2d7   :  { %867 = vmatmul.f32.vlgmr.msra.gmra.mxu2 %v834_v40 }
 0x35a   :  { %v868_v41 = vpop.f32.mrf.mxu2 }
 0x35b   :  { %973 = vmatmul.msk.f32.vlgmr.msra.gmra.mxu3 %vm872_vm11, %v868_v41 }
 0x3de   :  { %v897_v42 = vpop.f32.mrf.mxu3 }
 0x3df   :  { %v900_v43 = vmul.f32 %v897_v42, %v897_v42 }
 0x3e1   :  { %v902_v44 = vrot.slane %v900_v43, 7 }
 0x3e3   :  { %v904_v45 = vsub.f32 %v897_v42, %v902_v44 }
 0x3e5   :  { %v906_v46 = vadd.f32 1e-05, %v904_v45 }
 0x3e7   :  { %986 = vrsqrt.f32 %v906_v46  ;;  %vm913_vm13 = vweird.f32 %v906_v46 }
 0x3ed   :  { %v987_v47 = vpop.eup %986 }
 0x3ee   :  { %v908_v52 = vmul.f32 %v987_v47, %v906_v46  ;;  %vm914_vm12 = vweird.f32 %v987_v47 }
 0x3ef   :  { %vm915_vm14 = vmor %vm913_vm13, %vm914_vm12 }
 0x3f0   :  { %v909_v53 = vmul.f32 %v987_v47, %v908_v52 }
 0x3f2   :  { %v910_v54 = vmul.f32 0.5, %v909_v53 }
 0x3f4   :  { %v911_v55 = vsub.f32 1.5, %v910_v54 }
 0x3f6   :  { %v912_v56 = vmul.f32 %v987_v47, %v911_v55 }
 0x3f8   :  { %v916_v57 = vsel %vm915_vm14, %v987_v47, %v912_v56 }
 0x3f9   :  { %918 = vst [vmem:[#allocation1] sm:$0xff] %v916_v57 }
 0x400   :  { %v920_v59 = vld [vmem:[#allocation1 + $0x1] ss:$9 sm:$0xff] }
 0x401   :  { %v922_v60 = vmul.f32 %v920_v59, %v905_v58 }
 0x403   :  { %v924_v62 = vmul.f32 %v922_v60, %v897_v42  ;;  %v927_v63 = vperm.slane %v922_v60, 0 }
 0x405   :  { %v925_v0 = vsub.f32 %v923_v61, %v924_v62  ;;  %v929_v1 = vmul.f32 %v927_v63, %v812_v25  ;;  %v930_v2 = vmul.f32 %v927_v63, %v815_v28 }
 0x407   :  { %v932_v3 = vperm.slane %v925_v0, 0 }
 0x409   :  { %v934_v7 = vadd.f32 %v932_v3, %v929_v1  ;;  %v935_v8 = vadd.f32 %v932_v3, %v930_v2 }
 0x40b   :  { %v938_v9 = vadd.f32 %v936_v4, %v934_v7  ;;  %v939_v10 = vadd.f32 %v937_v6, %v935_v8 }
 0x40d   :  { %v940_v11 = vmax.f32 %v938_v9, 0.0  ;;  %v941_v13 = vmax.f32 %v939_v10, 0.0 }
 0x40f   :  { %942 = vst [vmem:[#allocation7] sm:$0xff] %v940_v11 }
 0x410   :  { %943 = vst [vmem:[#allocation7 + $0x8] sm:$0xff] %v941_v13 }
 0x411   :  { %956 = dma.vmem_to_hbm [thread:$0]  %s949_s12, 256, %s951_s8, [#allocation4], %s1070_s20, %s1070_s20, %s1071_s21  }
 0x412   :  { %1064 = dma.done.wait [#allocation4], 256  }
 0x413   :  { %1065 = vsyncadd [#allocation4], 4294967040 }
 0x414   :  { %961 = vsyncpa [#allocation3], 1 }
 0x415   :  { %962 = vsyncpa [#allocation6], 1 }
 0x416   :  { %963 = vsyncpa [#allocation4], 1 }

</bundles_post_ra>
